<compile_context>
chip_gen: v5e
topology: v5e:2x2
jax: 0.10.0
libtpu: 0.0.40
codegen_flags: <defaults>
</compile_context>

<pallas_src>
import functools

import jax
import jax.numpy as jnp
from jax.experimental import pallas as pl
from jax.experimental.pallas import tpu as pltpu


# --------------------------------------------------------------------------
# Model dimensions (small, consistent with the module's forward)
# --------------------------------------------------------------------------
B, C, H, W = 2, 4, 16, 16          # input image, NCHW (like PyTorch)
P = 4                              # patch size
N_PATCH = (H // P) * (W // P)      # 16 patch tokens
CPP = C * P * P                    # 64 = flattened patch length
D = 32                             # embed dim
N_HEADS = 4
DH = D // N_HEADS                  # 8
MLP_HIDDEN = 64
HEAD_OUT = 16                      # CLS head output dim
RECONS_OUT = CPP                   # reconstruction head output dim (64)
T = 1 + N_PATCH                    # 17 tokens (CLS at index 0)
T_PAD = 24                         # sublane-aligned token rows; rows >= T are masked
LN_EPS = 1e-6                      # ViT-style eps (torch default would be 1e-5)


# --------------------------------------------------------------------------
# Fused Pallas kernel: one grid step per batch element
# --------------------------------------------------------------------------
def _fused_kernel(patches_ref, tbias_ref, w_patch_ref,
                  ln1_g_ref, ln1_b_ref, w_qkv_ref, b_qkv_ref,
                  w_proj_ref, b_proj_ref, ln2_g_ref, ln2_b_ref,
                  w_fc1_ref, b_fc1_ref, w_fc2_ref, b_fc2_ref,
                  lnf_g_ref, lnf_b_ref, w_head_ref, b_head_ref,
                  w_rec_ref, b_rec_ref,
                  head_o_ref, rec_o_ref,
                  *, n_heads, dh, t_valid, eps):
    f32 = jnp.float32

    def ln(x, g_ref, b_ref):
        mu = jnp.mean(x, axis=-1, keepdims=True)
        var = jnp.mean((x - mu) ** 2, axis=-1, keepdims=True)
        return (x - mu) * jax.lax.rsqrt(var + eps) * g_ref[...] + b_ref[...]

    # ---- patch embed + CLS + positional bias ----
    # tbias already folds cls+pos[0] into row 0, b_patch+pos[i] into rows 1..N, zeros
    # into the pad rows; patches row 0 and pad rows are zero, so this is exact.
    patches = patches_ref[0].astype(f32)                              # [T_PAD, CPP]
    tok = jnp.dot(patches, w_patch_ref[...].astype(f32),
                  preferred_element_type=f32) + tbias_ref[...]        # [T_PAD, D]

    t_pad, d = tok.shape

    # ---- attention (pre-LN) ----
    h1 = ln(tok, ln1_g_ref, ln1_b_ref)
    qkv = jnp.dot(h1, w_qkv_ref[...], preferred_element_type=f32) + b_qkv_ref[...]  # [T_PAD, 3D]
    scale = 1.0 / (dh ** 0.5)
    q = qkv[:, 0 * d:1 * d] * scale        # fold 1/sqrt(dh) into q (T*dh work, not T*T)
    k = qkv[:, 1 * d:2 * d]
    v = qkv[:, 2 * d:3 * d]

    col = jax.lax.broadcasted_iota(jnp.int32, (t_pad, t_pad), 1)
    key_valid = col < t_valid              # mask padded key columns

    w_proj = w_proj_ref[...]
    attn_proj = jnp.zeros((t_pad, d), f32)
    for hh in range(n_heads):              # unrolled at trace time (n_heads = 4)
        sl = slice(hh * dh, (hh + 1) * dh)
        qh, kh, vh = q[:, sl], k[:, sl], v[:, sl]
        # q @ k^T without materializing a transpose: contract the last dims.
        s = jax.lax.dot_general(qh, kh, (((1,), (1,)), ((), ())),
                                preferred_element_type=f32)           # [T_PAD, T_PAD]
        s = jnp.where(key_valid, s, jnp.float32(-1e30))
        s = s - jnp.max(s, axis=-1, keepdims=True)
        p = jnp.exp(s)
        p = p * pl.reciprocal(jnp.sum(p, axis=-1, keepdims=True), approx=True)
        o_h = jnp.dot(p, vh, preferred_element_type=f32)              # [T_PAD, dh]
        # concat(o_h) @ W_proj  ==  sum_h o_h @ W_proj[h*dh:(h+1)*dh, :]
        attn_proj = attn_proj + jnp.dot(o_h, w_proj[sl, :], preferred_element_type=f32)

    tok = tok + attn_proj + b_proj_ref[...]

    # ---- MLP (pre-LN) ----
    h2 = ln(tok, ln2_g_ref, ln2_b_ref)
    h2 = jnp.dot(h2, w_fc1_ref[...], preferred_element_type=f32) + b_fc1_ref[...]
    # tanh-approximate GELU (jax.nn.gelu default); torch nn.GELU default is exact erf.
    h2 = jax.nn.gelu(h2)
    h2 = jnp.dot(h2, w_fc2_ref[...], preferred_element_type=f32) + b_fc2_ref[...]
    tok = tok + h2

    # ---- final LayerNorm (backbone.fc / backbone.head are Identity in FullPipline) ----
    out = ln(tok, lnf_g_ref, lnf_b_ref)                               # [T_PAD, D]

    # ---- fused heads: read `out` once (already in VMEM), write both outputs ----
    head_full = jnp.dot(out, w_head_ref[...], preferred_element_type=f32) + b_head_ref[...]
    head_o_ref[0] = head_full[0:1, :].astype(head_o_ref.dtype)        # CLS token -> head

    rec_full = jnp.dot(out, w_rec_ref[...], preferred_element_type=f32) + b_rec_ref[...]
    rec_o_ref[0] = rec_full[1:1 + (t_valid - 1), :].astype(rec_o_ref.dtype)  # patch tokens -> head_recons


# --------------------------------------------------------------------------
# Parameters & plain-JAX glue (reshape / transpose / pad only)
# --------------------------------------------------------------------------
def init_params(key):
    ks = jax.random.split(key, 16)
    n = lambda k, shape, s=0.02: (jax.random.normal(k, shape, jnp.float32) * s)
    z = lambda shape: jnp.zeros(shape, jnp.float32)
    o = lambda shape: jnp.ones(shape, jnp.float32)
    return dict(
        w_patch=n(ks[0], (CPP, D)), b_patch=z((1, D)),
        cls=n(ks[1], (1, 1, D)),
        pos=n(ks[2], (1, 1 + N_PATCH, D)),
        ln1_g=o((1, D)), ln1_b=z((1, D)),
        w_qkv=n(ks[3], (D, 3 * D)), b_qkv=z((1, 3 * D)),
        w_proj=n(ks[4], (D, D)), b_proj=z((1, D)),
        ln2_g=o((1, D)), ln2_b=z((1, D)),
        w_fc1=n(ks[5], (D, MLP_HIDDEN)), b_fc1=z((1, MLP_HIDDEN)),
        w_fc2=n(ks[6], (MLP_HIDDEN, D)), b_fc2=z((1, D)),
        lnf_g=o((1, D)), lnf_b=z((1, D)),
        w_head=n(ks[7], (D, HEAD_OUT)), b_head=z((1, HEAD_OUT)),
        w_rec=n(ks[8], (D, RECONS_OUT)), b_rec=z((1, RECONS_OUT)),
    )


def patchify(x):
    # NCHW -> [B, N, C*P*P] (equivalent to Conv2d(kernel=stride=P) unfolding)
    b, c, h, w = x.shape
    x = x.reshape(b, c, h // P, P, w // P, P)
    x = x.transpose(0, 2, 4, 1, 3, 5)
    return x.reshape(b, (h // P) * (w // P), c * P * P)


def full_pipeline_forward(x, params, recons=True):
    b = x.shape[0]

    # Padded patch matrix: row 0 (CLS slot) and rows >= T are zero.
    patches = patchify(x).astype(jnp.float32)                         # [B, N, CPP]
    patches_pad = jnp.zeros((b, T_PAD, CPP), jnp.float32)
    patches_pad = patches_pad.at[:, 1:1 + N_PATCH, :].set(patches)

    # Token bias: row 0 = cls + pos[0]; rows 1..N = b_patch + pos[1:]; pad rows = 0.
    tbias = jnp.zeros((T_PAD, D), jnp.float32)
    tbias = tbias.at[0, :].set(params["cls"][0, 0] + params["pos"][0, 0])
    tbias = tbias.at[1:1 + N_PATCH, :].set(params["b_patch"] + params["pos"][0, 1:])

    weights = (
        tbias, params["w_patch"],
        params["ln1_g"], params["ln1_b"], params["w_qkv"], params["b_qkv"],
        params["w_proj"], params["b_proj"], params["ln2_g"], params["ln2_b"],
        params["w_fc1"], params["b_fc1"], params["w_fc2"], params["b_fc2"],
        params["lnf_g"], params["lnf_b"], params["w_head"], params["b_head"],
        params["w_rec"], params["b_rec"],
    )

    def full_spec(a):  # weight/bias arrays: whole array as a single block, batch-invariant
        nd = a.ndim
        return pl.BlockSpec(a.shape, lambda i: (0,) * nd)

    in_specs = [pl.BlockSpec((1, T_PAD, CPP), lambda i: (i, 0, 0))]
    in_specs += [full_spec(w) for w in weights]

    out_specs = [
        pl.BlockSpec((1, 1, HEAD_OUT), lambda i: (i, 0, 0)),
        pl.BlockSpec((1, N_PATCH, RECONS_OUT), lambda i: (i, 0, 0)),
    ]
    out_shape = (
        jax.ShapeDtypeStruct((b, 1, HEAD_OUT), x.dtype),
        jax.ShapeDtypeStruct((b, N_PATCH, RECONS_OUT), x.dtype),
    )

    head3, rec = pl.pallas_call(
        functools.partial(_fused_kernel, n_heads=N_HEADS, dh=DH, t_valid=T, eps=LN_EPS),
        grid=(b,),
        in_specs=in_specs,
        out_specs=out_specs,
        out_shape=out_shape,
        compiler_params=pltpu.CompilerParams(dimension_semantics=("parallel",)),
    )(patches_pad, *weights)

    head_out = head3[:, 0, :]                                         # [B, HEAD_OUT]
    return (head_out, rec) if recons else (head_out, None)


# --------------------------------------------------------------------------

if __name__ == "__main__":
    key = jax.random.PRNGKey(0)
    k_param, k_x = jax.random.split(key)
    params = init_params(k_param)
    x = jax.random.normal(k_x, (B, C, H, W), jnp.float32)             # NCHW, like PyTorch

    fwd = jax.jit(functools.partial(full_pipeline_forward, recons=True))
    head_out, recons_out = fwd(x, params)
    jax.block_until_ready((head_out, recons_out))

    assert head_out.shape == (B, HEAD_OUT)
    assert recons_out.shape == (B, N_PATCH, RECONS_OUT)
    assert jnp.isfinite(head_out).all() and jnp.isfinite(recons_out).all()
    print("KERNEL_OK")
</pallas_src>

<mosaic_0001>
module attributes {stable_mosaic.version = 11 : i64} {
  func.func @_fused_kernel(%arg0: i32, %arg1: memref<1x24x64xf32, #tpu.memory_space<vmem>>, %arg2: memref<24x32xf32, #tpu.memory_space<vmem>>, %arg3: memref<64x32xf32, #tpu.memory_space<vmem>>, %arg4: memref<1x32xf32, #tpu.memory_space<vmem>>, %arg5: memref<1x32xf32, #tpu.memory_space<vmem>>, %arg6: memref<32x96xf32, #tpu.memory_space<vmem>>, %arg7: memref<1x96xf32, #tpu.memory_space<vmem>>, %arg8: memref<32x32xf32, #tpu.memory_space<vmem>>, %arg9: memref<1x32xf32, #tpu.memory_space<vmem>>, %arg10: memref<1x32xf32, #tpu.memory_space<vmem>>, %arg11: memref<1x32xf32, #tpu.memory_space<vmem>>, %arg12: memref<32x64xf32, #tpu.memory_space<vmem>>, %arg13: memref<1x64xf32, #tpu.memory_space<vmem>>, %arg14: memref<64x32xf32, #tpu.memory_space<vmem>>, %arg15: memref<1x32xf32, #tpu.memory_space<vmem>>, %arg16: memref<1x32xf32, #tpu.memory_space<vmem>>, %arg17: memref<1x32xf32, #tpu.memory_space<vmem>>, %arg18: memref<32x16xf32, #tpu.memory_space<vmem>>, %arg19: memref<1x16xf32, #tpu.memory_space<vmem>>, %arg20: memref<32x64xf32, #tpu.memory_space<vmem>>, %arg21: memref<1x64xf32, #tpu.memory_space<vmem>>, %arg22: memref<1x1x16xf32, #tpu.memory_space<vmem>>, %arg23: memref<1x16x64xf32, #tpu.memory_space<vmem>>) attributes {dimension_semantics = [#tpu.dimension_semantics<parallel>], iteration_bounds = array<i64: 2>, scalar_prefetch = 0 : i64, scratch_operands = 0 : i64, tpu.core_type = #tpu.core_type<tc>, window_params = [{transform_indices = @transform_0, window_bounds = array<i64: 1, 24, 64>}, {pipeline_mode = #tpu.pipeline_mode<synchronous>, transform_indices = @transform_1, window_bounds = array<i64: 24, 32>}, {pipeline_mode = #tpu.pipeline_mode<synchronous>, transform_indices = @transform_2, window_bounds = array<i64: 64, 32>}, {pipeline_mode = #tpu.pipeline_mode<synchronous>, transform_indices = @transform_3, window_bounds = array<i64: 1, 32>}, {pipeline_mode = #tpu.pipeline_mode<synchronous>, transform_indices = @transform_4, window_bounds = array<i64: 1, 32>}, {pipeline_mode = #tpu.pipeline_mode<synchronous>, transform_indices = @transform_5, window_bounds = array<i64: 32, 96>}, {pipeline_mode = #tpu.pipeline_mode<synchronous>, transform_indices = @transform_6, window_bounds = array<i64: 1, 96>}, {pipeline_mode = #tpu.pipeline_mode<synchronous>, transform_indices = @transform_7, window_bounds = array<i64: 32, 32>}, {pipeline_mode = #tpu.pipeline_mode<synchronous>, transform_indices = @transform_8, window_bounds = array<i64: 1, 32>}, {pipeline_mode = #tpu.pipeline_mode<synchronous>, transform_indices = @transform_9, window_bounds = array<i64: 1, 32>}, {pipeline_mode = #tpu.pipeline_mode<synchronous>, transform_indices = @transform_10, window_bounds = array<i64: 1, 32>}, {pipeline_mode = #tpu.pipeline_mode<synchronous>, transform_indices = @transform_11, window_bounds = array<i64: 32, 64>}, {pipeline_mode = #tpu.pipeline_mode<synchronous>, transform_indices = @transform_12, window_bounds = array<i64: 1, 64>}, {pipeline_mode = #tpu.pipeline_mode<synchronous>, transform_indices = @transform_13, window_bounds = array<i64: 64, 32>}, {pipeline_mode = #tpu.pipeline_mode<synchronous>, transform_indices = @transform_14, window_bounds = array<i64: 1, 32>}, {pipeline_mode = #tpu.pipeline_mode<synchronous>, transform_indices = @transform_15, window_bounds = array<i64: 1, 32>}, {pipeline_mode = #tpu.pipeline_mode<synchronous>, transform_indices = @transform_16, window_bounds = array<i64: 1, 32>}, {pipeline_mode = #tpu.pipeline_mode<synchronous>, transform_indices = @transform_17, window_bounds = array<i64: 32, 16>}, {pipeline_mode = #tpu.pipeline_mode<synchronous>, transform_indices = @transform_18, window_bounds = array<i64: 1, 16>}, {pipeline_mode = #tpu.pipeline_mode<synchronous>, transform_indices = @transform_19, window_bounds = array<i64: 32, 64>}, {pipeline_mode = #tpu.pipeline_mode<synchronous>, transform_indices = @transform_20, window_bounds = array<i64: 1, 64>}, {transform_indices = @transform_21, window_bounds = array<i64: 1, 1, 16>}, {transform_indices = @transform_22, window_bounds = array<i64: 1, 16, 64>}]} {
    %c0 = arith.constant 0 : index
    %c0_0 = arith.constant 0 : index
    %c0_1 = arith.constant 0 : index
    %0 = vector.load %arg1[%c0, %c0_0, %c0_1] : memref<1x24x64xf32, #tpu.memory_space<vmem>>, vector<1x24x64xf32>
    %1 = vector.shape_cast %0 : vector<1x24x64xf32> to vector<24x64xf32>
    %c0_2 = arith.constant 0 : index
    %c0_3 = arith.constant 0 : index
    %2 = vector.load %arg3[%c0_2, %c0_3] : memref<64x32xf32, #tpu.memory_space<vmem>>, vector<64x32xf32>
    %cst = arith.constant dense<0.000000e+00> : vector<24x32xf32>
    %3 = tpu.matmul %1, %2, %cst {dimension_numbers = #tpu.dot_dimension_numbers<[1], [0], [0], [1], [0, 0, 1, 1], [], []>} : vector<24x64xf32>, vector<64x32xf32>, vector<24x32xf32> -> vector<24x32xf32>
    %c0_4 = arith.constant 0 : index
    %c0_5 = arith.constant 0 : index
    %4 = vector.load %arg2[%c0_4, %c0_5] : memref<24x32xf32, #tpu.memory_space<vmem>>, vector<24x32xf32>
    %5 = arith.addf %3, %4 : vector<24x32xf32>
    %cst_6 = arith.constant dense<0.000000e+00> : vector<24xf32>
    %6 = vector.multi_reduction <add>, %5, %cst_6 [1] : vector<24x32xf32> to vector<24xf32>
    %7 = vector.shape_cast %6 : vector<24xf32> to vector<24x1xf32>
    %cst_7 = arith.constant 3.200000e+01 : f32
    %8 = vector.broadcast %cst_7 : f32 to vector<24x1xf32>
    %9 = arith.divf %7, %8 : vector<24x1xf32>
    %10 = vector.broadcast %9 : vector<24x1xf32> to vector<24x32xf32>
    %11 = arith.subf %5, %10 : vector<24x32xf32>
    %12 = arith.mulf %11, %11 : vector<24x32xf32>
    %cst_8 = arith.constant dense<0.000000e+00> : vector<24xf32>
    %13 = vector.multi_reduction <add>, %12, %cst_8 [1] : vector<24x32xf32> to vector<24xf32>
    %14 = vector.shape_cast %13 : vector<24xf32> to vector<24x1xf32>
    %cst_9 = arith.constant 3.200000e+01 : f32
    %15 = vector.broadcast %cst_9 : f32 to vector<24x1xf32>
    %16 = arith.divf %14, %15 : vector<24x1xf32>
    %17 = vector.broadcast %9 : vector<24x1xf32> to vector<24x32xf32>
    %18 = arith.subf %5, %17 : vector<24x32xf32>
    %cst_10 = arith.constant 9.99999997E-7 : f32
    %19 = vector.broadcast %cst_10 : f32 to vector<24x1xf32>
    %20 = arith.addf %16, %19 : vector<24x1xf32>
    %21 = math.rsqrt %20 : vector<24x1xf32>
    %22 = vector.broadcast %21 : vector<24x1xf32> to vector<24x32xf32>
    %23 = arith.mulf %18, %22 : vector<24x32xf32>
    %c0_11 = arith.constant 0 : index
    %c0_12 = arith.constant 0 : index
    %24 = vector.load %arg4[%c0_11, %c0_12] : memref<1x32xf32, #tpu.memory_space<vmem>>, vector<1x32xf32>
    %25 = vector.broadcast %24 : vector<1x32xf32> to vector<24x32xf32>
    %26 = arith.mulf %23, %25 : vector<24x32xf32>
    %c0_13 = arith.constant 0 : index
    %c0_14 = arith.constant 0 : index
    %27 = vector.load %arg5[%c0_13, %c0_14] : memref<1x32xf32, #tpu.memory_space<vmem>>, vector<1x32xf32>
    %28 = vector.broadcast %27 : vector<1x32xf32> to vector<24x32xf32>
    %29 = arith.addf %26, %28 : vector<24x32xf32>
    %c0_15 = arith.constant 0 : index
    %c0_16 = arith.constant 0 : index
    %30 = vector.load %arg6[%c0_15, %c0_16] : memref<32x96xf32, #tpu.memory_space<vmem>>, vector<32x96xf32>
    %cst_17 = arith.constant dense<0.000000e+00> : vector<24x96xf32>
    %31 = tpu.matmul %29, %30, %cst_17 {dimension_numbers = #tpu.dot_dimension_numbers<[1], [0], [0], [1], [0, 0, 1, 1], [], []>} : vector<24x32xf32>, vector<32x96xf32>, vector<24x96xf32> -> vector<24x96xf32>
    %c0_18 = arith.constant 0 : index
    %c0_19 = arith.constant 0 : index
    %32 = vector.load %arg7[%c0_18, %c0_19] : memref<1x96xf32, #tpu.memory_space<vmem>>, vector<1x96xf32>
    %33 = vector.broadcast %32 : vector<1x96xf32> to vector<24x96xf32>
    %34 = arith.addf %31, %33 : vector<24x96xf32>
    %35 = vector.extract_strided_slice %34 {offsets = [0, 0], sizes = [24, 32], strides = [1, 1]} : vector<24x96xf32> to vector<24x32xf32>
    %cst_20 = arith.constant 0.353553385 : f32
    %36 = vector.broadcast %cst_20 : f32 to vector<24x32xf32>
    %37 = arith.mulf %35, %36 : vector<24x32xf32>
    %38 = vector.extract_strided_slice %34 {offsets = [0, 32], sizes = [24, 32], strides = [1, 1]} : vector<24x96xf32> to vector<24x32xf32>
    %39 = vector.extract_strided_slice %34 {offsets = [0, 64], sizes = [24, 32], strides = [1, 1]} : vector<24x96xf32> to vector<24x32xf32>
    %40 = tpu.iota {dimensions = array<i32: 1>} : vector<24x24xi32>
    %c17_i32 = arith.constant 17 : i32
    %41 = vector.broadcast %c17_i32 : i32 to vector<24x24xi32>
    %42 = arith.cmpi slt, %40, %41 : vector<24x24xi32>
    %c0_21 = arith.constant 0 : index
    %c0_22 = arith.constant 0 : index
    %43 = vector.load %arg8[%c0_21, %c0_22] : memref<32x32xf32, #tpu.memory_space<vmem>>, vector<32x32xf32>
    %cst_23 = arith.constant 0.000000e+00 : f32
    %44 = vector.broadcast %cst_23 : f32 to vector<24x32xf32>
    %45 = vector.extract_strided_slice %37 {offsets = [0, 0], sizes = [24, 8], strides = [1, 1]} : vector<24x32xf32> to vector<24x8xf32>
    %46 = vector.extract_strided_slice %38 {offsets = [0, 0], sizes = [24, 8], strides = [1, 1]} : vector<24x32xf32> to vector<24x8xf32>
    %47 = vector.extract_strided_slice %39 {offsets = [0, 0], sizes = [24, 8], strides = [1, 1]} : vector<24x32xf32> to vector<24x8xf32>
    %cst_24 = arith.constant dense<0.000000e+00> : vector<24x24xf32>
    %48 = tpu.matmul %45, %46, %cst_24 {dimension_numbers = #tpu.dot_dimension_numbers<[1], [1], [0], [0], [0, 0, 1, 0], [], []>} : vector<24x8xf32>, vector<24x8xf32>, vector<24x24xf32> -> vector<24x24xf32>
    %cst_25 = arith.constant -1.000000e+30 : f32
    %49 = vector.broadcast %cst_25 : f32 to vector<24x24xf32>
    %50 = arith.select %42, %48, %49 : vector<24x24xi1>, vector<24x24xf32>
    %cst_26 = arith.constant dense<0xFF800000> : vector<24xf32>
    %51 = vector.multi_reduction <maximumf>, %50, %cst_26 [1] : vector<24x24xf32> to vector<24xf32>
    %52 = vector.shape_cast %51 : vector<24xf32> to vector<24x1xf32>
    %53 = vector.broadcast %52 : vector<24x1xf32> to vector<24x24xf32>
    %54 = arith.subf %50, %53 : vector<24x24xf32>
    %55 = math.exp %54 : vector<24x24xf32>
    %cst_27 = arith.constant dense<0.000000e+00> : vector<24xf32>
    %56 = vector.multi_reduction <add>, %55, %cst_27 [1] : vector<24x24xf32> to vector<24xf32>
    %57 = vector.shape_cast %56 : vector<24xf32> to vector<24x1xf32>
    %58 = tpu.reciprocal %57 {approx = true} : vector<24x1xf32> -> vector<24x1xf32>
    %59 = vector.broadcast %58 : vector<24x1xf32> to vector<24x24xf32>
    %60 = arith.mulf %55, %59 : vector<24x24xf32>
    %cst_28 = arith.constant dense<0.000000e+00> : vector<24x8xf32>
    %61 = tpu.matmul %60, %47, %cst_28 {dimension_numbers = #tpu.dot_dimension_numbers<[1], [0], [0], [1], [0, 0, 1, 1], [], []>} : vector<24x24xf32>, vector<24x8xf32>, vector<24x8xf32> -> vector<24x8xf32>
    %62 = vector.extract_strided_slice %43 {offsets = [0, 0], sizes = [8, 32], strides = [1, 1]} : vector<32x32xf32> to vector<8x32xf32>
    %cst_29 = arith.constant dense<0.000000e+00> : vector<24x32xf32>
    %63 = tpu.matmul %61, %62, %cst_29 {dimension_numbers = #tpu.dot_dimension_numbers<[1], [0], [0], [1], [0, 0, 1, 1], [], []>} : vector<24x8xf32>, vector<8x32xf32>, vector<24x32xf32> -> vector<24x32xf32>
    %64 = arith.addf %44, %63 : vector<24x32xf32>
    %65 = vector.extract_strided_slice %37 {offsets = [0, 8], sizes = [24, 8], strides = [1, 1]} : vector<24x32xf32> to vector<24x8xf32>
    %66 = vector.extract_strided_slice %38 {offsets = [0, 8], sizes = [24, 8], strides = [1, 1]} : vector<24x32xf32> to vector<24x8xf32>
    %67 = vector.extract_strided_slice %39 {offsets = [0, 8], sizes = [24, 8], strides = [1, 1]} : vector<24x32xf32> to vector<24x8xf32>
    %cst_30 = arith.constant dense<0.000000e+00> : vector<24x24xf32>
    %68 = tpu.matmul %65, %66, %cst_30 {dimension_numbers = #tpu.dot_dimension_numbers<[1], [1], [0], [0], [0, 0, 1, 0], [], []>} : vector<24x8xf32>, vector<24x8xf32>, vector<24x24xf32> -> vector<24x24xf32>
    %cst_31 = arith.constant -1.000000e+30 : f32
    %69 = vector.broadcast %cst_31 : f32 to vector<24x24xf32>
    %70 = arith.select %42, %68, %69 : vector<24x24xi1>, vector<24x24xf32>
    %cst_32 = arith.constant dense<0xFF800000> : vector<24xf32>
    %71 = vector.multi_reduction <maximumf>, %70, %cst_32 [1] : vector<24x24xf32> to vector<24xf32>
    %72 = vector.shape_cast %71 : vector<24xf32> to vector<24x1xf32>
    %73 = vector.broadcast %72 : vector<24x1xf32> to vector<24x24xf32>
    %74 = arith.subf %70, %73 : vector<24x24xf32>
    %75 = math.exp %74 : vector<24x24xf32>
    %cst_33 = arith.constant dense<0.000000e+00> : vector<24xf32>
    %76 = vector.multi_reduction <add>, %75, %cst_33 [1] : vector<24x24xf32> to vector<24xf32>
    %77 = vector.shape_cast %76 : vector<24xf32> to vector<24x1xf32>
    %78 = tpu.reciprocal %77 {approx = true} : vector<24x1xf32> -> vector<24x1xf32>
    %79 = vector.broadcast %78 : vector<24x1xf32> to vector<24x24xf32>
    %80 = arith.mulf %75, %79 : vector<24x24xf32>
    %cst_34 = arith.constant dense<0.000000e+00> : vector<24x8xf32>
    %81 = tpu.matmul %80, %67, %cst_34 {dimension_numbers = #tpu.dot_dimension_numbers<[1], [0], [0], [1], [0, 0, 1, 1], [], []>} : vector<24x24xf32>, vector<24x8xf32>, vector<24x8xf32> -> vector<24x8xf32>
    %82 = vector.extract_strided_slice %43 {offsets = [8, 0], sizes = [8, 32], strides = [1, 1]} : vector<32x32xf32> to vector<8x32xf32>
    %cst_35 = arith.constant dense<0.000000e+00> : vector<24x32xf32>
    %83 = tpu.matmul %81, %82, %cst_35 {dimension_numbers = #tpu.dot_dimension_numbers<[1], [0], [0], [1], [0, 0, 1, 1], [], []>} : vector<24x8xf32>, vector<8x32xf32>, vector<24x32xf32> -> vector<24x32xf32>
    %84 = arith.addf %64, %83 : vector<24x32xf32>
    %85 = vector.extract_strided_slice %37 {offsets = [0, 16], sizes = [24, 8], strides = [1, 1]} : vector<24x32xf32> to vector<24x8xf32>
    %86 = vector.extract_strided_slice %38 {offsets = [0, 16], sizes = [24, 8], strides = [1, 1]} : vector<24x32xf32> to vector<24x8xf32>
    %87 = vector.extract_strided_slice %39 {offsets = [0, 16], sizes = [24, 8], strides = [1, 1]} : vector<24x32xf32> to vector<24x8xf32>
    %cst_36 = arith.constant dense<0.000000e+00> : vector<24x24xf32>
    %88 = tpu.matmul %85, %86, %cst_36 {dimension_numbers = #tpu.dot_dimension_numbers<[1], [1], [0], [0], [0, 0, 1, 0], [], []>} : vector<24x8xf32>, vector<24x8xf32>, vector<24x24xf32> -> vector<24x24xf32>
    %cst_37 = arith.constant -1.000000e+30 : f32
    %89 = vector.broadcast %cst_37 : f32 to vector<24x24xf32>
    %90 = arith.select %42, %88, %89 : vector<24x24xi1>, vector<24x24xf32>
    %cst_38 = arith.constant dense<0xFF800000> : vector<24xf32>
    %91 = vector.multi_reduction <maximumf>, %90, %cst_38 [1] : vector<24x24xf32> to vector<24xf32>
    %92 = vector.shape_cast %91 : vector<24xf32> to vector<24x1xf32>
    %93 = vector.broadcast %92 : vector<24x1xf32> to vector<24x24xf32>
    %94 = arith.subf %90, %93 : vector<24x24xf32>
    %95 = math.exp %94 : vector<24x24xf32>
    %cst_39 = arith.constant dense<0.000000e+00> : vector<24xf32>
    %96 = vector.multi_reduction <add>, %95, %cst_39 [1] : vector<24x24xf32> to vector<24xf32>
    %97 = vector.shape_cast %96 : vector<24xf32> to vector<24x1xf32>
    %98 = tpu.reciprocal %97 {approx = true} : vector<24x1xf32> -> vector<24x1xf32>
    %99 = vector.broadcast %98 : vector<24x1xf32> to vector<24x24xf32>
    %100 = arith.mulf %95, %99 : vector<24x24xf32>
    %cst_40 = arith.constant dense<0.000000e+00> : vector<24x8xf32>
    %101 = tpu.matmul %100, %87, %cst_40 {dimension_numbers = #tpu.dot_dimension_numbers<[1], [0], [0], [1], [0, 0, 1, 1], [], []>} : vector<24x24xf32>, vector<24x8xf32>, vector<24x8xf32> -> vector<24x8xf32>
    %102 = vector.extract_strided_slice %43 {offsets = [16, 0], sizes = [8, 32], strides = [1, 1]} : vector<32x32xf32> to vector<8x32xf32>
    %cst_41 = arith.constant dense<0.000000e+00> : vector<24x32xf32>
    %103 = tpu.matmul %101, %102, %cst_41 {dimension_numbers = #tpu.dot_dimension_numbers<[1], [0], [0], [1], [0, 0, 1, 1], [], []>} : vector<24x8xf32>, vector<8x32xf32>, vector<24x32xf32> -> vector<24x32xf32>
    %104 = arith.addf %84, %103 : vector<24x32xf32>
    %105 = vector.extract_strided_slice %37 {offsets = [0, 24], sizes = [24, 8], strides = [1, 1]} : vector<24x32xf32> to vector<24x8xf32>
    %106 = vector.extract_strided_slice %38 {offsets = [0, 24], sizes = [24, 8], strides = [1, 1]} : vector<24x32xf32> to vector<24x8xf32>
    %107 = vector.extract_strided_slice %39 {offsets = [0, 24], sizes = [24, 8], strides = [1, 1]} : vector<24x32xf32> to vector<24x8xf32>
    %cst_42 = arith.constant dense<0.000000e+00> : vector<24x24xf32>
    %108 = tpu.matmul %105, %106, %cst_42 {dimension_numbers = #tpu.dot_dimension_numbers<[1], [1], [0], [0], [0, 0, 1, 0], [], []>} : vector<24x8xf32>, vector<24x8xf32>, vector<24x24xf32> -> vector<24x24xf32>
    %cst_43 = arith.constant -1.000000e+30 : f32
    %109 = vector.broadcast %cst_43 : f32 to vector<24x24xf32>
    %110 = arith.select %42, %108, %109 : vector<24x24xi1>, vector<24x24xf32>
    %cst_44 = arith.constant dense<0xFF800000> : vector<24xf32>
    %111 = vector.multi_reduction <maximumf>, %110, %cst_44 [1] : vector<24x24xf32> to vector<24xf32>
    %112 = vector.shape_cast %111 : vector<24xf32> to vector<24x1xf32>
    %113 = vector.broadcast %112 : vector<24x1xf32> to vector<24x24xf32>
    %114 = arith.subf %110, %113 : vector<24x24xf32>
    %115 = math.exp %114 : vector<24x24xf32>
    %cst_45 = arith.constant dense<0.000000e+00> : vector<24xf32>
    %116 = vector.multi_reduction <add>, %115, %cst_45 [1] : vector<24x24xf32> to vector<24xf32>
    %117 = vector.shape_cast %116 : vector<24xf32> to vector<24x1xf32>
    %118 = tpu.reciprocal %117 {approx = true} : vector<24x1xf32> -> vector<24x1xf32>
    %119 = vector.broadcast %118 : vector<24x1xf32> to vector<24x24xf32>
    %120 = arith.mulf %115, %119 : vector<24x24xf32>
    %cst_46 = arith.constant dense<0.000000e+00> : vector<24x8xf32>
    %121 = tpu.matmul %120, %107, %cst_46 {dimension_numbers = #tpu.dot_dimension_numbers<[1], [0], [0], [1], [0, 0, 1, 1], [], []>} : vector<24x24xf32>, vector<24x8xf32>, vector<24x8xf32> -> vector<24x8xf32>
    %122 = vector.extract_strided_slice %43 {offsets = [24, 0], sizes = [8, 32], strides = [1, 1]} : vector<32x32xf32> to vector<8x32xf32>
    %cst_47 = arith.constant dense<0.000000e+00> : vector<24x32xf32>
    %123 = tpu.matmul %121, %122, %cst_47 {dimension_numbers = #tpu.dot_dimension_numbers<[1], [0], [0], [1], [0, 0, 1, 1], [], []>} : vector<24x8xf32>, vector<8x32xf32>, vector<24x32xf32> -> vector<24x32xf32>
    %124 = arith.addf %104, %123 : vector<24x32xf32>
    %125 = arith.addf %5, %124 : vector<24x32xf32>
    %c0_48 = arith.constant 0 : index
    %c0_49 = arith.constant 0 : index
    %126 = vector.load %arg9[%c0_48, %c0_49] : memref<1x32xf32, #tpu.memory_space<vmem>>, vector<1x32xf32>
    %127 = vector.broadcast %126 : vector<1x32xf32> to vector<24x32xf32>
    %128 = arith.addf %125, %127 : vector<24x32xf32>
    %cst_50 = arith.constant dense<0.000000e+00> : vector<24xf32>
    %129 = vector.multi_reduction <add>, %128, %cst_50 [1] : vector<24x32xf32> to vector<24xf32>
    %130 = vector.shape_cast %129 : vector<24xf32> to vector<24x1xf32>
    %cst_51 = arith.constant 3.200000e+01 : f32
    %131 = vector.broadcast %cst_51 : f32 to vector<24x1xf32>
    %132 = arith.divf %130, %131 : vector<24x1xf32>
    %133 = vector.broadcast %132 : vector<24x1xf32> to vector<24x32xf32>
    %134 = arith.subf %128, %133 : vector<24x32xf32>
    %135 = arith.mulf %134, %134 : vector<24x32xf32>
    %cst_52 = arith.constant dense<0.000000e+00> : vector<24xf32>
    %136 = vector.multi_reduction <add>, %135, %cst_52 [1] : vector<24x32xf32> to vector<24xf32>
    %137 = vector.shape_cast %136 : vector<24xf32> to vector<24x1xf32>
    %cst_53 = arith.constant 3.200000e+01 : f32
    %138 = vector.broadcast %cst_53 : f32 to vector<24x1xf32>
    %139 = arith.divf %137, %138 : vector<24x1xf32>
    %140 = vector.broadcast %132 : vector<24x1xf32> to vector<24x32xf32>
    %141 = arith.subf %128, %140 : vector<24x32xf32>
    %cst_54 = arith.constant 9.99999997E-7 : f32
    %142 = vector.broadcast %cst_54 : f32 to vector<24x1xf32>
    %143 = arith.addf %139, %142 : vector<24x1xf32>
    %144 = math.rsqrt %143 : vector<24x1xf32>
    %145 = vector.broadcast %144 : vector<24x1xf32> to vector<24x32xf32>
    %146 = arith.mulf %141, %145 : vector<24x32xf32>
    %c0_55 = arith.constant 0 : index
    %c0_56 = arith.constant 0 : index
    %147 = vector.load %arg10[%c0_55, %c0_56] : memref<1x32xf32, #tpu.memory_space<vmem>>, vector<1x32xf32>
    %148 = vector.broadcast %147 : vector<1x32xf32> to vector<24x32xf32>
    %149 = arith.mulf %146, %148 : vector<24x32xf32>
    %c0_57 = arith.constant 0 : index
    %c0_58 = arith.constant 0 : index
    %150 = vector.load %arg11[%c0_57, %c0_58] : memref<1x32xf32, #tpu.memory_space<vmem>>, vector<1x32xf32>
    %151 = vector.broadcast %150 : vector<1x32xf32> to vector<24x32xf32>
    %152 = arith.addf %149, %151 : vector<24x32xf32>
    %c0_59 = arith.constant 0 : index
    %c0_60 = arith.constant 0 : index
    %153 = vector.load %arg12[%c0_59, %c0_60] : memref<32x64xf32, #tpu.memory_space<vmem>>, vector<32x64xf32>
    %cst_61 = arith.constant dense<0.000000e+00> : vector<24x64xf32>
    %154 = tpu.matmul %152, %153, %cst_61 {dimension_numbers = #tpu.dot_dimension_numbers<[1], [0], [0], [1], [0, 0, 1, 1], [], []>} : vector<24x32xf32>, vector<32x64xf32>, vector<24x64xf32> -> vector<24x64xf32>
    %c0_62 = arith.constant 0 : index
    %c0_63 = arith.constant 0 : index
    %155 = vector.load %arg13[%c0_62, %c0_63] : memref<1x64xf32, #tpu.memory_space<vmem>>, vector<1x64xf32>
    %156 = vector.broadcast %155 : vector<1x64xf32> to vector<24x64xf32>
    %157 = arith.addf %154, %156 : vector<24x64xf32>
    %158 = arith.mulf %157, %157 : vector<24x64xf32>
    %159 = arith.mulf %157, %158 : vector<24x64xf32>
    %cst_64 = arith.constant 4.471500e-02 : f32
    %160 = vector.broadcast %cst_64 : f32 to vector<24x64xf32>
    %161 = arith.mulf %160, %159 : vector<24x64xf32>
    %162 = arith.addf %157, %161 : vector<24x64xf32>
    %cst_65 = arith.constant 0.797884583 : f32
    %163 = vector.broadcast %cst_65 : f32 to vector<24x64xf32>
    %164 = arith.mulf %163, %162 : vector<24x64xf32>
    %165 = math.tanh %164 : vector<24x64xf32>
    %cst_66 = arith.constant 1.000000e+00 : f32
    %166 = vector.broadcast %cst_66 : f32 to vector<24x64xf32>
    %167 = arith.addf %166, %165 : vector<24x64xf32>
    %cst_67 = arith.constant 5.000000e-01 : f32
    %168 = vector.broadcast %cst_67 : f32 to vector<24x64xf32>
    %169 = arith.mulf %168, %167 : vector<24x64xf32>
    %170 = arith.mulf %157, %169 : vector<24x64xf32>
    %c0_68 = arith.constant 0 : index
    %c0_69 = arith.constant 0 : index
    %171 = vector.load %arg14[%c0_68, %c0_69] : memref<64x32xf32, #tpu.memory_space<vmem>>, vector<64x32xf32>
    %cst_70 = arith.constant dense<0.000000e+00> : vector<24x32xf32>
    %172 = tpu.matmul %170, %171, %cst_70 {dimension_numbers = #tpu.dot_dimension_numbers<[1], [0], [0], [1], [0, 0, 1, 1], [], []>} : vector<24x64xf32>, vector<64x32xf32>, vector<24x32xf32> -> vector<24x32xf32>
    %c0_71 = arith.constant 0 : index
    %c0_72 = arith.constant 0 : index
    %173 = vector.load %arg15[%c0_71, %c0_72] : memref<1x32xf32, #tpu.memory_space<vmem>>, vector<1x32xf32>
    %174 = vector.broadcast %173 : vector<1x32xf32> to vector<24x32xf32>
    %175 = arith.addf %172, %174 : vector<24x32xf32>
    %176 = arith.addf %128, %175 : vector<24x32xf32>
    %cst_73 = arith.constant dense<0.000000e+00> : vector<24xf32>
    %177 = vector.multi_reduction <add>, %176, %cst_73 [1] : vector<24x32xf32> to vector<24xf32>
    %178 = vector.shape_cast %177 : vector<24xf32> to vector<24x1xf32>
    %cst_74 = arith.constant 3.200000e+01 : f32
    %179 = vector.broadcast %cst_74 : f32 to vector<24x1xf32>
    %180 = arith.divf %178, %179 : vector<24x1xf32>
    %181 = vector.broadcast %180 : vector<24x1xf32> to vector<24x32xf32>
    %182 = arith.subf %176, %181 : vector<24x32xf32>
    %183 = arith.mulf %182, %182 : vector<24x32xf32>
    %cst_75 = arith.constant dense<0.000000e+00> : vector<24xf32>
    %184 = vector.multi_reduction <add>, %183, %cst_75 [1] : vector<24x32xf32> to vector<24xf32>
    %185 = vector.shape_cast %184 : vector<24xf32> to vector<24x1xf32>
    %cst_76 = arith.constant 3.200000e+01 : f32
    %186 = vector.broadcast %cst_76 : f32 to vector<24x1xf32>
    %187 = arith.divf %185, %186 : vector<24x1xf32>
    %188 = vector.broadcast %180 : vector<24x1xf32> to vector<24x32xf32>
    %189 = arith.subf %176, %188 : vector<24x32xf32>
    %cst_77 = arith.constant 9.99999997E-7 : f32
    %190 = vector.broadcast %cst_77 : f32 to vector<24x1xf32>
    %191 = arith.addf %187, %190 : vector<24x1xf32>
    %192 = math.rsqrt %191 : vector<24x1xf32>
    %193 = vector.broadcast %192 : vector<24x1xf32> to vector<24x32xf32>
    %194 = arith.mulf %189, %193 : vector<24x32xf32>
    %c0_78 = arith.constant 0 : index
    %c0_79 = arith.constant 0 : index
    %195 = vector.load %arg16[%c0_78, %c0_79] : memref<1x32xf32, #tpu.memory_space<vmem>>, vector<1x32xf32>
    %196 = vector.broadcast %195 : vector<1x32xf32> to vector<24x32xf32>
    %197 = arith.mulf %194, %196 : vector<24x32xf32>
    %c0_80 = arith.constant 0 : index
    %c0_81 = arith.constant 0 : index
    %198 = vector.load %arg17[%c0_80, %c0_81] : memref<1x32xf32, #tpu.memory_space<vmem>>, vector<1x32xf32>
    %199 = vector.broadcast %198 : vector<1x32xf32> to vector<24x32xf32>
    %200 = arith.addf %197, %199 : vector<24x32xf32>
    %c0_82 = arith.constant 0 : index
    %c0_83 = arith.constant 0 : index
    %201 = vector.load %arg18[%c0_82, %c0_83] : memref<32x16xf32, #tpu.memory_space<vmem>>, vector<32x16xf32>
    %cst_84 = arith.constant dense<0.000000e+00> : vector<24x16xf32>
    %202 = tpu.matmul %200, %201, %cst_84 {dimension_numbers = #tpu.dot_dimension_numbers<[1], [0], [0], [1], [0, 0, 1, 1], [], []>} : vector<24x32xf32>, vector<32x16xf32>, vector<24x16xf32> -> vector<24x16xf32>
    %c0_85 = arith.constant 0 : index
    %c0_86 = arith.constant 0 : index
    %203 = vector.load %arg19[%c0_85, %c0_86] : memref<1x16xf32, #tpu.memory_space<vmem>>, vector<1x16xf32>
    %204 = vector.broadcast %203 : vector<1x16xf32> to vector<24x16xf32>
    %205 = arith.addf %202, %204 : vector<24x16xf32>
    %206 = vector.extract_strided_slice %205 {offsets = [0, 0], sizes = [1, 16], strides = [1, 1]} : vector<24x16xf32> to vector<1x16xf32>
    %c0_87 = arith.constant 0 : index
    %c0_88 = arith.constant 0 : index
    %c0_89 = arith.constant 0 : index
    %207 = vector.load %arg22[%c0_87, %c0_88, %c0_89] : memref<1x1x16xf32, #tpu.memory_space<vmem>>, vector<1x1x16xf32>
    %208 = vector.shape_cast %207 : vector<1x1x16xf32> to vector<1x16xf32>
    %209 = vector.shape_cast %206 : vector<1x16xf32> to vector<1x1x16xf32>
    tpu.vector_store %arg22[%c0_87, %c0_88, %c0_89], %209 {strides = array<i32>} : memref<1x1x16xf32, #tpu.memory_space<vmem>>, vector<1x1x16xf32>,
    %c0_90 = arith.constant 0 : index
    %c0_91 = arith.constant 0 : index
    %210 = vector.load %arg20[%c0_90, %c0_91] : memref<32x64xf32, #tpu.memory_space<vmem>>, vector<32x64xf32>
    %cst_92 = arith.constant dense<0.000000e+00> : vector<24x64xf32>
    %211 = tpu.matmul %200, %210, %cst_92 {dimension_numbers = #tpu.dot_dimension_numbers<[1], [0], [0], [1], [0, 0, 1, 1], [], []>} : vector<24x32xf32>, vector<32x64xf32>, vector<24x64xf32> -> vector<24x64xf32>
    %c0_93 = arith.constant 0 : index
    %c0_94 = arith.constant 0 : index
    %212 = vector.load %arg21[%c0_93, %c0_94] : memref<1x64xf32, #tpu.memory_space<vmem>>, vector<1x64xf32>
    %213 = vector.broadcast %212 : vector<1x64xf32> to vector<24x64xf32>
    %214 = arith.addf %211, %213 : vector<24x64xf32>
    %215 = vector.extract_strided_slice %214 {offsets = [1, 0], sizes = [16, 64], strides = [1, 1]} : vector<24x64xf32> to vector<16x64xf32>
    %c0_95 = arith.constant 0 : index
    %c0_96 = arith.constant 0 : index
    %c0_97 = arith.constant 0 : index
    %216 = vector.load %arg23[%c0_95, %c0_96, %c0_97] : memref<1x16x64xf32, #tpu.memory_space<vmem>>, vector<1x16x64xf32>
    %217 = vector.shape_cast %216 : vector<1x16x64xf32> to vector<16x64xf32>
    %218 = vector.shape_cast %215 : vector<16x64xf32> to vector<1x16x64xf32>
    tpu.vector_store %arg23[%c0_95, %c0_96, %c0_97], %218 {strides = array<i32>} : memref<1x16x64xf32, #tpu.memory_space<vmem>>, vector<1x16x64xf32>,
    return
  }
  func.func @transform_0(%arg0: i32) -> (i32, i32, i32) {
    %c0_i32 = arith.constant 0 : i32
    %c0_i32_0 = arith.constant 0 : i32
    %c0_i32_1 = arith.constant 0 : i32
    return %arg0, %c0_i32, %c0_i32_0 : i32, i32, i32
  }
  func.func @transform_1(%arg0: i32) -> (i32, i32) {
    %c0_i32 = arith.constant 0 : i32
    %c0_i32_0 = arith.constant 0 : i32
    %c0_i32_1 = arith.constant 0 : i32
    return %c0_i32, %c0_i32_0 : i32, i32
  }
  func.func @transform_2(%arg0: i32) -> (i32, i32) {
    %c0_i32 = arith.constant 0 : i32
    %c0_i32_0 = arith.constant 0 : i32
    %c0_i32_1 = arith.constant 0 : i32
    return %c0_i32, %c0_i32_0 : i32, i32
  }
  func.func @transform_3(%arg0: i32) -> (i32, i32) {
    %c0_i32 = arith.constant 0 : i32
    %c0_i32_0 = arith.constant 0 : i32
    %c0_i32_1 = arith.constant 0 : i32
    return %c0_i32, %c0_i32_0 : i32, i32
  }
  func.func @transform_4(%arg0: i32) -> (i32, i32) {
    %c0_i32 = arith.constant 0 : i32
    %c0_i32_0 = arith.constant 0 : i32
    %c0_i32_1 = arith.constant 0 : i32
    return %c0_i32, %c0_i32_0 : i32, i32
  }
  func.func @transform_5(%arg0: i32) -> (i32, i32) {
    %c0_i32 = arith.constant 0 : i32
    %c0_i32_0 = arith.constant 0 : i32
    %c0_i32_1 = arith.constant 0 : i32
    return %c0_i32, %c0_i32_0 : i32, i32
  }
  func.func @transform_6(%arg0: i32) -> (i32, i32) {
    %c0_i32 = arith.constant 0 : i32
    %c0_i32_0 = arith.constant 0 : i32
    %c0_i32_1 = arith.constant 0 : i32
    return %c0_i32, %c0_i32_0 : i32, i32
  }
  func.func @transform_7(%arg0: i32) -> (i32, i32) {
    %c0_i32 = arith.constant 0 : i32
    %c0_i32_0 = arith.constant 0 : i32
    %c0_i32_1 = arith.constant 0 : i32
    return %c0_i32, %c0_i32_0 : i32, i32
  }
  func.func @transform_8(%arg0: i32) -> (i32, i32) {
    %c0_i32 = arith.constant 0 : i32
    %c0_i32_0 = arith.constant 0 : i32
    %c0_i32_1 = arith.constant 0 : i32
    return %c0_i32, %c0_i32_0 : i32, i32
  }
  func.func @transform_9(%arg0: i32) -> (i32, i32) {
    %c0_i32 = arith.constant 0 : i32
    %c0_i32_0 = arith.constant 0 : i32
    %c0_i32_1 = arith.constant 0 : i32
    return %c0_i32, %c0_i32_0 : i32, i32
  }
  func.func @transform_10(%arg0: i32) -> (i32, i32) {
    %c0_i32 = arith.constant 0 : i32
    %c0_i32_0 = arith.constant 0 : i32
    %c0_i32_1 = arith.constant 0 : i32
    return %c0_i32, %c0_i32_0 : i32, i32
  }
  func.func @transform_11(%arg0: i32) -> (i32, i32) {
    %c0_i32 = arith.constant 0 : i32
    %c0_i32_0 = arith.constant 0 : i32
    %c0_i32_1 = arith.constant 0 : i32
    return %c0_i32, %c0_i32_0 : i32, i32
  }
  func.func @transform_12(%arg0: i32) -> (i32, i32) {
    %c0_i32 = arith.constant 0 : i32
    %c0_i32_0 = arith.constant 0 : i32
    %c0_i32_1 = arith.constant 0 : i32
    return %c0_i32, %c0_i32_0 : i32, i32
  }
  func.func @transform_13(%arg0: i32) -> (i32, i32) {
    %c0_i32 = arith.constant 0 : i32
    %c0_i32_0 = arith.constant 0 : i32
    %c0_i32_1 = arith.constant 0 : i32
    return %c0_i32, %c0_i32_0 : i32, i32
  }
  func.func @transform_14(%arg0: i32) -> (i32, i32) {
    %c0_i32 = arith.constant 0 : i32
    %c0_i32_0 = arith.constant 0 : i32
    %c0_i32_1 = arith.constant 0 : i32
    return %c0_i32, %c0_i32_0 : i32, i32
  }
  func.func @transform_15(%arg0: i32) -> (i32, i32) {
    %c0_i32 = arith.constant 0 : i32
    %c0_i32_0 = arith.constant 0 : i32
    %c0_i32_1 = arith.constant 0 : i32
    return %c0_i32, %c0_i32_0 : i32, i32
  }
  func.func @transform_16(%arg0: i32) -> (i32, i32) {
    %c0_i32 = arith.constant 0 : i32
    %c0_i32_0 = arith.constant 0 : i32
    %c0_i32_1 = arith.constant 0 : i32
    return %c0_i32, %c0_i32_0 : i32, i32
  }
  func.func @transform_17(%arg0: i32) -> (i32, i32) {
    %c0_i32 = arith.constant 0 : i32
    %c0_i32_0 = arith.constant 0 : i32
    %c0_i32_1 = arith.constant 0 : i32
    return %c0_i32, %c0_i32_0 : i32, i32
  }
  func.func @transform_18(%arg0: i32) -> (i32, i32) {
    %c0_i32 = arith.constant 0 : i32
    %c0_i32_0 = arith.constant 0 : i32
    %c0_i32_1 = arith.constant 0 : i32
    return %c0_i32, %c0_i32_0 : i32, i32
  }
  func.func @transform_19(%arg0: i32) -> (i32, i32) {
    %c0_i32 = arith.constant 0 : i32
    %c0_i32_0 = arith.constant 0 : i32
    %c0_i32_1 = arith.constant 0 : i32
    return %c0_i32, %c0_i32_0 : i32, i32
  }
  func.func @transform_20(%arg0: i32) -> (i32, i32) {
    %c0_i32 = arith.constant 0 : i32
    %c0_i32_0 = arith.constant 0 : i32
    %c0_i32_1 = arith.constant 0 : i32
    return %c0_i32, %c0_i32_0 : i32, i32
  }
  func.func @transform_21(%arg0: i32) -> (i32, i32, i32) {
    %c0_i32 = arith.constant 0 : i32
    %c0_i32_0 = arith.constant 0 : i32
    %c0_i32_1 = arith.constant 0 : i32
    return %arg0, %c0_i32, %c0_i32_0 : i32, i32, i32
  }
  func.func @transform_22(%arg0: i32) -> (i32, i32, i32) {
    %c0_i32 = arith.constant 0 : i32
    %c0_i32_0 = arith.constant 0 : i32
    %c0_i32_1 = arith.constant 0 : i32
    return %arg0, %c0_i32, %c0_i32_0 : i32, i32, i32
  }
}

</mosaic_0001>

<bundles_post_ra>
// kernel: full_pipeline_forward.1
= control target key start
LH: loop header
LB: loop body
LE: loop exit
PB: predicated region body
PF: predicated region fallthrough
CT: control target
= control target key end

     0   :  { %s3110_s0 = inlined_call_operand.vmem [shape: f32[2,24,64], index: 0, kind: input, shape index: {}]   ;;  %s3111_s1 = inlined_call_operand.vmem [shape: f32[24,32], index: 1, kind: input, shape index: {}]   ;;  %s3112_s2 = inlined_call_operand.vmem [shape: f32[64,32], index: 2, kind: input, shape index: {}]   ;;  %s3113_s3 = inlined_call_operand.vmem [shape: f32[1,32], index: 3, kind: input, shape index: {}]   ;;  %s3114_s4 = inlined_call_operand.vmem [shape: f32[1,32], index: 4, kind: input, shape index: {}]   ;;  %s3115_s5 = inlined_call_operand.vmem [shape: f32[32,96], index: 5, kind: input, shape index: {}]   ;;  %s3116_s6 = inlined_call_operand.vmem [shape: f32[1,96], index: 6, kind: input, shape index: {}]   ;;  %s3117_s7 = inlined_call_operand.vmem [shape: f32[32,32], index: 7, kind: input, shape index: {}]   ;;  %s3118_s8 = inlined_call_operand.vmem [shape: f32[1,32], index: 8, kind: input, shape index: {}]   ;;  %s3119_s9 = inlined_call_operand.vmem [shape: f32[1,32], index: 9, kind: input, shape index: {}]   ;;  %s3120_s10 = inlined_call_operand.vmem [shape: f32[1,32], index: 10, kind: input, shape index: {}]   ;;  %s3121_s11 = inlined_call_operand.vmem [shape: f32[32,64], index: 11, kind: input, shape index: {}]   ;;  %s3122_s12 = inlined_call_operand.vmem [shape: f32[1,64], index: 12, kind: input, shape index: {}]   ;;  %s3123_s13 = inlined_call_operand.vmem [shape: f32[64,32], index: 13, kind: input, shape index: {}]   ;;  %s3124_s14 = inlined_call_operand.vmem [shape: f32[1,32], index: 14, kind: input, shape index: {}]   ;;  %s3125_s15 = inlined_call_operand.vmem [shape: f32[1,32], index: 15, kind: input, shape index: {}]   ;;  %s3126_s16 = inlined_call_operand.vmem [shape: f32[1,32], index: 16, kind: input, shape index: {}]   ;;  %s3127_s17 = inlined_call_operand.vmem [shape: f32[32,16], index: 17, kind: input, shape index: {}]   ;;  %s3128_s18 = inlined_call_operand.vmem [shape: f32[1,16], index: 18, kind: input, shape index: {}]   ;;  %s3129_s19 = inlined_call_operand.vmem [shape: f32[32,64], index: 19, kind: input, shape index: {}]   ;;  %s3130_s20 = inlined_call_operand.vmem [shape: f32[1,64], index: 20, kind: input, shape index: {}]   ;;  %s3131_s21 = inlined_call_operand.hbm [shape: f32[2,1,16], index: 21, kind: output, shape index: {0}]   ;;  %s3132_s22 = inlined_call_operand.hbm [shape: f32[2,16,64], index: 22, kind: output, shape index: {1}]  }
   0x1   :  { %3146 = sst [smem:[#allocation15_spill]] %s3110_s0 }
   0x2   :  { %3147 = sst [smem:[#allocation16_spill]] %s3111_s1 }
   0x3   :  { %3148 = sst [smem:[#allocation17_spill]] %s3112_s2 }
   0x4   :  { %3149 = sst [smem:[#allocation18_spill]] %s3113_s3 }
   0x5   :  { %3150 = sst [smem:[#allocation19_spill]] %s3114_s4 }
   0x6   :  { %3151 = sst [smem:[#allocation20_spill]] %s3115_s5 }
   0x7   :  { %3152 = sst [smem:[#allocation21_spill]] %s3116_s6 }
   0x8   :  { %3153 = sst [smem:[#allocation22_spill]] %s3117_s7 }
   0x9   :  { %3154 = sst [smem:[#allocation23_spill]] %s3118_s8 }
   0xa   :  { %3155 = sst [smem:[#allocation24_spill]] %s3119_s9 }
   0xb   :  { %3156 = sst [smem:[#allocation25_spill]] %s3120_s10 }
   0xc   :  { %3157 = sst [smem:[#allocation26_spill]] %s3132_s22 }
   0xd   :  { %28 = vsyncpa [#allocation3], 0 }
   0xe   :  { %30 = vsyncpa [#allocation3 + $0x1], 0 }
   0xf   :  { %31 = vsyncpa [#allocation5], 0 }
  0x10   :  { %33 = vsyncpa [#allocation5 + $0x1], 0  ;;  %s2521_s3 = smov 0   ;;  %s2523_s28 = smov 0  }
  0x11   :  { %s2525_s29 = smov 0   ;;  %s2527_s30 = smov 0  }
  0x12 LB: > { %3158 = sst [smem:[#allocation8_spill]] %s2378_s3  ;;  %s2542_s4 = sadd.s32 4294967295, %s2390_s30   ;;  %s2390_s30 = sphi %s2527_s30, %s3185_s30   ;;  %s2386_s29 = sphi %s2525_s29, %s3187_s29   ;;  %s2382_s28 = sphi %s2523_s28, %s3189_s28   ;;  %s2378_s3 = sphi %s2521_s3, %s3188_s3  }
  0x13   : > { %3159 = sst [smem:[#allocation9_spill]] %s2386_s29  ;;  %s2046_s0 = sadd.s32 4294967294, %s2390_s30  }
  0x14   : > { %3160 = sst [smem:[#allocation10_spill]] %s2390_s30  ;;  %s2546_s23 = sadd.s32 1, %s2390_s30  }
  0x15   : > { %3161 = sst [smem:[#allocation11_spill]] %s2546_s23  ;;  %s492_s1 = sadd.s32 1, %s2386_s29 }
  0x16   : > { %s489_s5 = ssub.s32 %s2390_s30, %s2546_s23  ;;  %p502_p0 = scmp.ne.s32.totalorder %s2386_s29, %s2382_s28 }
  0x17   : > { %p490_p1 = scmp.eq.s32.totalorder %s489_s5, 0  ;;  %p503_p2 = scmp.eq.s32.totalorder %s2542_s4, 1 }
  0x18   : > { %p508_p3 = scmp.ne.s32.totalorder %s2382_s28, %s2378_s3  ;;  %p509_p4 = scmp.eq.s32.totalorder %s2046_s0, 1 }
  0x19   : > { %s2557_s24 = scalar_select %p490_p1, %s2386_s29, %s492_s1  }
  0x1a   : > { %p2559_p5 = por %p503_p2, %p502_p0  ;;  %p2563_p6 = por %p509_p4, %p508_p3 }
  0x1b   : > { %3162 = sst [smem:[#allocation12_spill]] %s2557_s24  ;;  %p2049_p7 = scmp.ge.s32.totalorder %s2390_s30, 1 }
  0x1c   : > { %s3163_s6 = scalar_select %p2559_p5, 1, 0 }
  0x1d   : > { %s3165_s25 = scalar_select %p2563_p6, 1, 0 }
  0x1e   : > { %3164 = sst [smem:[#allocation13_spill]] %s3163_s6  ;;  %p621_p8 = scmp.lt.s32.totalorder %s2390_s30, 3 }
  0x1f   : > { %3166 = sst [smem:[#allocation14_spill]] %s3165_s25 }
  0x20   : > { %p622_p9 = pnand %p2049_p7, %p621_p8 }
  0x21   : > { %s3167_s27 = sld [smem:[#allocation17_spill]] (!%p622_p9)  ;;  %p687_p10 = scmp.lt.s32.totalorder (!%p622_p9), %s2542_s4, 1 }
  0x22   : > { %625 = sbr.rel (%p622_p9) target bundleno = 2917 (0xb65), region = 104  ;;  %s3168_s30 = sld [smem:[#allocation15_spill]] (!%p622_p9) }
  0x23   : > { %s3171_s29 = sld [smem:[#allocation20_spill]] (!%p622_p9)  ;;  %s2394_s6 = smov (!%p622_p9), 64  }
  0x24   : > { %s3173_s24 = sld [smem:[#allocation18_spill]] (!%p622_p9)  ;;  %s2396_s1 = smov (!%p622_p9), 120  }
  0x25   : > { %s3174_s26 = sld [smem:[#allocation19_spill]] (!%p622_p9)  ;;  %s2398_s5 = smov (!%p622_p9), 112  }
  0x26   : > { %s3176_s7 = sld [smem:[#allocation22_spill]] (!%p622_p9) }
  0x27   : > { %v702_v0 = vld [vmem:[%s3167_s27 + $0x38] sm:$0xff]  ;;  %v701_v1 = vld [vmem:[%s3167_s27 + $0x30] sm:$0xff]  ;;  %v700_v2 = vld [vmem:[%s3167_s27 + $0x28] sm:$0xff]  ;;  %s688_s25 = scalar_select %p687_p10, %s2542_s4, 1  ;;  %vm706_vm0 = vcmask 523264   ;;  %vm742_vm1 = vcmask 261120  }
  0x28   : > { %724 = vmatpush.msra.mxu0 %v702_v0  ;;  %v699_v3 = vld [vmem:[%s3167_s27 + $0x20] sm:$0xff]  ;;  %v698_v4 = vld [vmem:[%s3167_s27 + $0x18] sm:$0xff]  ;;  %v697_v5 = vld [vmem:[%s3167_s27 + $0x10] sm:$0xff]  ;;  %v2392_v23 = vmov 32.0   ;;  %vm892_vm12 = vcmask 64512   ;;  %vm937_vm14 = vcmask 195584  }
  0x29   : > { %s2131_s3 = smul.u32 24, %s688_s25  ;;  %v696_v6 = vld [vmem:[%s3167_s27 + $0x8] sm:$0xff]  ;;  %v695_v7 = vld [vmem:[%s3167_s27] sm:$0xff]  ;;  %2222 = vrcp.f32 %v2392_v23  ;;  %s3172_s23 = smov %s3171_s29  ;;  %v833_v45 = vld [vmem:[%s3171_s29 + $0x18] sm:$0xff] }
  0x2a   : > { %725 = vmatpush.msra.mxu0 %v701_v1  ;;  %2124 = vmatpush.msra.mxu2 %v833_v45  ;;  %v832_v46 = vld [vmem:[%s3172_s23 + $0x10] sm:$0xff]  ;;  %v831_v47 = vld [vmem:[%s3172_s23 + $0x8] sm:$0xff]  ;;  %v830_v48 = vld [vmem:[%s3172_s23] sm:$0xff]  ;;  %s2399_s29 = smov 104   ;;  %s3177_s8 = sld [smem:[#allocation23_spill]] }
  0x2b   : > { %s691_s22 = scalar_lea.vmem %s3168_s30, %s2131_s3  ;;  %s3169_s3 = sld [smem:[#allocation16_spill]]  ;;  %859 = vmatpush.msra.mxu1 %v833_v45 }
  0x2c   : > { %726 = vmatpush.msra.mxu0 %v700_v2  ;;  %v692_v8 = vld [vmem:[%s691_s22] sm:$0xff]  ;;  %v693_v9 = vld [vmem:[%s691_s22 + $0x8] sm:$0xff]  ;;  %v694_v10 = vld [vmem:[%s691_s22 + $0x10] sm:$0xff]  ;;  %2125 = vmatpush.msra.mxu2 %v832_v46  ;;  %s2393_s30 = smov 96   ;;  %s2395_s22 = smov 88  }
  0x2d   : > { %860 = vmatpush.msra.mxu1 %v832_v46  ;;  %v2210_v2 = vld [vmem:[%s3173_s24] ss:$0 sm:$0xff]  ;;  %s2397_s24 = smov 80   ;;  %s3178_s9 = sld [smem:[#allocation24_spill]] }
  0x2e   : > { %727 = vmatpush.msra.mxu0 %v699_v3  ;;  %2126 = vmatpush.msra.mxu2 %v831_v47  ;;  %s3179_s10 = sld [smem:[#allocation25_spill]] }
  0x2f   : > { %v2223_v24 = vpop.eup %2222  ;;  %861 = vmatpush.msra.mxu1 %v831_v47 }
  0x30   : > { %728 = vmatpush.msra.mxu0 %v698_v4  ;;  %v753_v25 = vmul.f32 32.0, %v2223_v24  ;;  %vm757_vm2 = vweird.f32 %v2223_v24  ;;  %2127 = vmatpush.msra.mxu2 %v830_v48 }
  0x31   : > { %s3170_s0 = smov %s3169_s3  ;;  %v703_v11 = vld [vmem:[%s3169_s3] sm:$0xff]  ;;  %862 = vmatpush.msra.mxu1 %v830_v48  ;;  %s3175_s3 = sld [smem:[#allocation21_spill]] }
  0x32   : > { %729 = vmatpush.msra.mxu0 %v697_v5  ;;  %v704_v15 = vld [vmem:[%s3170_s0 + $0x8] sm:$0xff]  ;;  %v705_v19 = vld [vmem:[%s3170_s0 + $0x10] sm:$0xff]  ;;  %v754_v26 = vsub.f32 1.0, %v753_v25 }
  0x34   : > { %730 = vmatpush.msra.mxu0 %v696_v6  ;;  %v755_v27 = vmul.f32 %v2223_v24, %v754_v26  ;;  %v2211_v6 = vld [vmem:[%s3174_s26] ss:$0 sm:$0xff]  ;;  %s2400_s26 = smov 72  }
  0x36   : > { %731 = vmatpush.msra.mxu0 %v695_v7  ;;  %v756_v28 = vadd.f32 %v2223_v24, %v755_v27 }
  0x37   : > { %2052 = vmatmul.msk.f32.vlgmr.msra.gmra.mxu0 %vm706_vm0, %v692_v8 }
  0x38   : > { %v2622_v29 = vsel %vm757_vm2, %v2223_v24, %v756_v28 }
  0x3f   : > { %2053 = vmatmul.msk.f32.gmra.mxu0 %vm706_vm0, %v693_v9 }
  0x47   : > { %2054 = vmatmul.msk.f32.gmra.mxu0 %vm706_vm0, %v694_v10 }
  0xb4   : > { %v733_v12 = vpop.f32.mrf.mxu0 }
  0xb5   : > { %v2604_v13 = vadd.f32 %v733_v12, %v703_v11 }
  0xb7   : > { %v743_v14 = vsel %vm742_vm1, %v2604_v13, 0.0 }
  0xb8   : > { %744 = vadd.xlane.f32.xlu1 %v743_v14 }
  0xbc   : > { %v736_v16 = vpop.f32.mrf.mxu0 }
  0xbd   : > { %v2611_v17 = vadd.f32 %v736_v16, %v704_v15 }
  0xbf   : > { %v746_v18 = vsel %vm742_vm1, %v2611_v17, 0.0 }
  0xc0   : > { %747 = vadd.xlane.f32.xlu0 %v746_v18 }
  0xc4   : > { %v739_v20 = vpop.f32.mrf.mxu0 }
  0xc5   : > { %v2618_v21 = vadd.f32 %v739_v20, %v705_v19 }
  0xc7   : > { %v749_v22 = vsel %vm742_vm1, %v2618_v21, 0.0 }
  0xc8   : > { %750 = vadd.xlane.f32.xlu0 %v749_v22 }
 0x12b   : > { %v745_v35 = vpop.xlane.xlu1 %744 }
 0x12c   : > { %v759_v38 = vmul.f32 %v2622_v29, %v745_v35 }
 0x12e   : > { %v2631_v41 = vsub.f32 %v2604_v13, %v759_v38 }
 0x130   : > { %v765_v43 = vmul.f32 %v2631_v41, %v2631_v41 }
 0x132   : > { %v768_v44 = vsel %vm742_vm1, %v765_v43, 0.0  ;;  %v876_v43 = vlaneseq }
 0x133   : > { %v748_v30 = vpop.xlane.xlu0 %747 }
 0x134   : > { %v760_v31 = vmul.f32 %v2622_v29, %v748_v30  ;;  %v2212_v30 = vld [vmem:[%s3175_s3] ss:$0 sm:$0xff]  ;;  %s2401_s3 = smov 56  }
 0x136   : > { %v763_v32 = vsub.f32 %v2611_v17, %v760_v31 }
 0x138   : > { %v766_v33 = vmul.f32 %v763_v32, %v763_v32 }
 0x13a   : > { %v771_v34 = vsel %vm742_vm1, %v766_v33, 0.0 }
 0x13b   : > { %v751_v36 = vpop.xlane.xlu0 %750  ;;  %772 = vadd.xlane.f32.xlu1 %v771_v34 }
 0x13c   : > { %v761_v37 = vmul.f32 %v2622_v29, %v751_v36 }
 0x13e   : > { %v764_v39 = vsub.f32 %v2618_v21, %v761_v37 }
 0x140   : > { %v767_v40 = vmul.f32 %v764_v39, %v764_v39 }
 0x142   : > { %v774_v42 = vsel %vm742_vm1, %v767_v40, 0.0 }
 0x143   : > { %775 = vadd.xlane.f32.xlu2 %v774_v42 }
 0x14b   : > { %769 = vadd.xlane.f32.xlu2 %v768_v44  ;;  %v2689_v44 = vand.u32 127, %v876_v43 }
 0x14d   : > { %vm878_vm13 = vcmp.lt.s32.totalorder %v2689_v44, 17 }
 0x1ae   : > { %v773_v49 = vpop.xlane.xlu1 %772 }
 0x1af   : > { %v778_v50 = vmul.f32 %v773_v49, %v2622_v29 }
 0x1b1   : > { %v781_v51 = vadd.f32 1e-06, %v778_v50 }
 0x1b3   : > { %2224 = vrsqrt.f32 %v781_v51  ;;  %vm799_vm4 = vweird.f32 %v781_v51 }
 0x1b6   : > { %v776_v52 = vpop.xlane.xlu2 %775 }
 0x1b7   : > { %v779_v53 = vmul.f32 %v776_v52, %v2622_v29 }
 0x1b9   : > { %v2225_v54 = vpop.eup %2224  ;;  %v782_v55 = vadd.f32 1e-06, %v779_v53 }
 0x1ba   : > { %v794_v56 = vmul.f32 %v2225_v54, %v781_v51  ;;  %vm800_vm3 = vweird.f32 %v2225_v54 }
 0x1bb   : > { %2226 = vrsqrt.f32 %v782_v55  ;;  %vm801_vm5 = vmor %vm799_vm4, %vm800_vm3  ;;  %vm809_vm7 = vweird.f32 %v782_v55 }
 0x1bc   : > { %v795_v57 = vmul.f32 %v2225_v54, %v794_v56 }
 0x1be   : > { %v796_v58 = vmul.f32 0.5, %v795_v57  ;;  %v770_v59 = vpop.xlane.xlu2 %769 }
 0x1bf   : > { %v777_v60 = vmul.f32 %v770_v59, %v2622_v29 }
 0x1c0   : > { %v797_v61 = vsub.f32 1.5, %v796_v58 }
 0x1c1   : > { %v2227_v62 = vpop.eup %2226  ;;  %v780_v63 = vadd.f32 1e-06, %v777_v60 }
 0x1c2   : > { %v798_v0 = vmul.f32 %v2225_v54, %v797_v61  ;;  %v804_v1 = vmul.f32 %v2227_v62, %v782_v55  ;;  %vm810_vm6 = vweird.f32 %v2227_v62 }
 0x1c3   : > { %2228 = vrsqrt.f32 %v780_v63  ;;  %vm811_vm8 = vmor %vm809_vm7, %vm810_vm6  ;;  %vm789_vm10 = vweird.f32 %v780_v63 }
 0x1c4   : > { %v802_v3 = vsel %vm801_vm5, %v2225_v54, %v798_v0  ;;  %v805_v4 = vmul.f32 %v2227_v62, %v804_v1 }
 0x1c5   : > { %v814_v5 = vmul.f32 %v802_v3, %v763_v32 }
 0x1c6   : > { %v806_v7 = vmul.f32 0.5, %v805_v4 }
 0x1c7   : > { %v821_v8 = vmul.f32 %v2210_v2, %v814_v5 }
 0x1c8   : > { %v807_v9 = vsub.f32 1.5, %v806_v7 }
 0x1c9   : > { %v2229_v10 = vpop.eup %2228  ;;  %v828_v11 = vadd.f32 %v2211_v6, %v821_v8 }
 0x1ca   : > { %v808_v12 = vmul.f32 %v2227_v62, %v807_v9  ;;  %v784_v14 = vmul.f32 %v2229_v10, %v780_v63  ;;  %vm790_vm9 = vweird.f32 %v2229_v10 }
 0x1cb   : > { %2056 = vmatmul.msk.f32.vlgmr.msra.gmra.mxu2 %vm742_vm1, %v828_v11  ;;  %vm791_vm11 = vmor %vm789_vm10, %vm790_vm9 }
 0x1cc   : > { %v812_v15 = vsel %vm811_vm8, %v2227_v62, %v808_v12  ;;  %v785_v16 = vmul.f32 %v2229_v10, %v784_v14 }
 0x1cd   : > { %v815_v18 = vmul.f32 %v812_v15, %v764_v39 }
 0x1ce   : > { %v786_v19 = vmul.f32 0.5, %v785_v16 }
 0x1cf   : > { %v822_v20 = vmul.f32 %v2210_v2, %v815_v18 }
 0x1d0   : > { %v787_v22 = vsub.f32 1.5, %v786_v19 }
 0x1d1   : > { %v829_v23 = vadd.f32 %v2211_v6, %v822_v20  ;;  %v879_v20 = vld [vmem:[%s3176_s7] sm:$0xff] }
 0x1d2   : > { %v788_v24 = vmul.f32 %v2229_v10, %v787_v22 }
 0x1d3   : > { %2057 = vmatmul.msk.f32.gmra.mxu2 %vm742_vm1, %v829_v23 }
 0x1d4   : > { %v792_v25 = vsel %vm791_vm11, %v2229_v10, %v788_v24 }
 0x1d5   : > { %v813_v26 = vmul.f32 %v792_v25, %v2631_v41 }
 0x1d7   : > { %v820_v27 = vmul.f32 %v2210_v2, %v813_v26 }
 0x1d9   : > { %v827_v28 = vadd.f32 %v2211_v6, %v820_v27 }
 0x1db   : > { %2055 = vmatmul.msk.f32.vlgmr.msra.gmra.mxu1 %vm742_vm1, %v827_v28 }
 0x24e   : > { %v867_v31 = vpop.f32.mrf.mxu2 }
 0x24f   : > { %v2665_v32 = vadd.f32 %v2212_v30, %v867_v31 }
 0x251   : > { %888 = vrot.lane.b32.xlu1 %v2665_v32, %s2393_s30  ;;  %v874_v41 = vmul.f32 0.35355338, %v2665_v32 }
 0x256   : > { %v870_v33 = vpop.f32.mrf.mxu2 }
 0x257   : > { %v2668_v34 = vadd.f32 %v2212_v30, %v870_v33 }
 0x258   : > { %v864_v35 = vpop.f32.mrf.mxu1 }
 0x259   : > { %v2670_v36 = vadd.f32 %v2212_v30, %v864_v35  ;;  %890 = vrot.lane.b32.xlu0 %v2668_v34, %s2393_s30  ;;  %v2685_v42 = vmul.f32 0.35355338, %v2668_v34  ;;  %v2703_v54 = vpack.i.bf16 %v2665_v32, %v2668_v34 }
 0x25b   : > { %886 = vrot.lane.b32.xlu2 %v2670_v36, %s2393_s30  ;;  %v2678_v40 = vmul.f32 0.35355338, %v2670_v36  ;;  %s2402_s30 = smov 40  }
 0x2b5   : > { %v887_v39 = vpop.permute.xlu2 %886 }
 0x2c3   : > { %v889_v38 = vpop.permute.xlu1 %888 }
 0x2cb   : > { %v891_v37 = vpop.permute.xlu0 %890 }
 0x2cc   : > { %2058 = vmatpush.xpose.msk.msrb.mxu2 %vm892_vm12, %v891_v37 }
 0x2d0   : > { %2059 = vmatpush.xpose.msk.msrb.mxu2 %vm892_vm12, %v889_v38 }
 0x2d4   : > { %2060 = vmatpush.xpose.msk.msrb.mxu2 %vm892_vm12, %v887_v39 }
 0x2d7   : > { %2061 = vmatmul.msk.f32.vlgmr.msrb.gmra.mxu2 %vm892_vm12, %v2678_v40 }
 0x2df   : > { %2062 = vmatmul.msk.f32.gmra.mxu2 %vm892_vm12, %v874_v41 }
 0x2e7   : > { %2063 = vmatmul.msk.f32.gmra.mxu2 %vm892_vm12, %v2685_v42 }
 0x35a   : > { %v925_v45 = vpop.f32.mrf.mxu2 }
 0x35b   : > { %v934_v46 = vsel %vm878_vm13, %v925_v45, -1e+30 }
 0x35c   : > { %v938_v47 = vsel %vm937_vm14, %v934_v46, -inf }
 0x35d   : > { %939 = vmax.xlane.f32.xlu0 %v938_v47 }
 0x362   : > { %v928_v48 = vpop.f32.mrf.mxu2 }
 0x363   : > { %v935_v49 = vsel %vm878_vm13, %v928_v48, -1e+30 }
 0x364   : > { %v941_v50 = vsel %vm937_vm14, %v935_v49, -inf }
 0x365   : > { %942 = vmax.xlane.f32.xlu2 %v941_v50 }
 0x36a   : > { %v931_v51 = vpop.f32.mrf.mxu2 }
 0x36b   : > { %v936_v52 = vsel %vm878_vm13, %v931_v51, -1e+30 }
 0x36c   : > { %v944_v53 = vsel %vm937_vm14, %v936_v52, -inf }
 0x36d   : > { %945 = vmax.xlane.f32.xlu1 %v944_v53 }
 0x386   : > { %2191 = vrot.lane.b32.xlu1 %v2703_v54, %s2394_s6 }
 0x38e   : > { %1021 = vrot.lane.b32.xlu1 %v2670_v36, %s2395_s22 }
 0x396   : > { %1017 = vrot.lane.b32.xlu1 %v874_v41, %s2396_s1 }
 0x39e   : > { %1223 = vrot.lane.b32.xlu1 %v2665_v32, %s2397_s24 }
 0x3a6   : > { %1215 = vrot.lane.b32.xlu1 %v2678_v40, %s2398_s5 }
 0x3ae   : > { %1217 = vrot.lane.b32.xlu1 %v874_v41, %s2398_s5 }
 0x3b6   : > { %1385 = vrot.lane.b32.xlu1 %v874_v41, %s2399_s29 }
 0x3d0   : > { %v940_v55 = vpop.xlane.xlu0 %939 }
 0x3d1   : > { %v947_v56 = vsub.f32 %v934_v46, %v940_v55 }
 0x3d3   : > { %v950_v57 = vmul.f32 1.442695, %v947_v56 }
 0x3d5   : > { %2230 = vpow2.f32 %v950_v57 }
 0x3d8   : > { %v943_v58 = vpop.xlane.xlu2 %942 }
 0x3d9   : > { %v948_v59 = vsub.f32 %v935_v49, %v943_v58 }
 0x3db   : > { %v2231_v60 = vpop.eup %2230  ;;  %v952_v61 = vmul.f32 1.442695, %v948_v59 }
 0x3dc   : > { %v956_v62 = vsel %vm937_vm14, %v2231_v60, 0.0 }
 0x3dd   : > { %2232 = vpow2.f32 %v952_v61  ;;  %957 = vadd.xlane.f32.xlu0 %v956_v62 }
 0x3e0   : > { %v946_v63 = vpop.xlane.xlu1 %945 }
 0x3e1   : > { %v949_v0 = vsub.f32 %v936_v52, %v946_v63 }
 0x3e3   : > { %v2233_v1 = vpop.eup %2232  ;;  %v954_v2 = vmul.f32 1.442695, %v949_v0 }
 0x3e4   : > { %v959_v3 = vsel %vm937_vm14, %v2233_v1, 0.0 }
 0x3e5   : > { %2234 = vpow2.f32 %v954_v2  ;;  %960 = vadd.xlane.f32.xlu2 %v959_v3 }
 0x3eb   : > { %v2235_v4 = vpop.eup %2234 }
 0x3ec   : > { %v962_v5 = vsel %vm937_vm14, %v2235_v4, 0.0 }
 0x3ed   : > { %963 = vadd.xlane.f32.xlu2 %v962_v5 }
 0x3f1   : > { %971 = vrot.lane.b32.xlu0 %v2670_v36, %s2394_s6  ;;  %s2403_s6 = smov 48  }
 0x3f8   : > { %v2192_v6 = vpop.permute.xlu1 %2191 }
 0x3f9   : > { %1023 = vrot.lane.b32.xlu0 %v2665_v32, %s2395_s22  ;;  %v2193_v7 = vunpack.i.l.bf16 %v2192_v6  ;;  %v2194_v8 = vunpack.i.h.bf16 %v2192_v6 }
 0x3fb   : > { %1002 = vmatpush.msrb.mxu0 %v2193_v7  ;;  %2128 = vmatpush.msra.mxu3 %v2193_v7 }
 0x3fd   : > { %1003 = vmatpush.msrb.mxu0 %v2194_v8  ;;  %2129 = vmatpush.msra.mxu3 %v2194_v8 }
 0x400   : > { %v1022_v15 = vpop.permute.xlu1 %1021 }
 0x401   : > { %1015 = vrot.lane.b32.xlu0 %v2678_v40, %s2396_s1 }
 0x405   : > { %1025 = vrot.lane.b32.xlu2 %v2668_v34, %s2395_s22  ;;  %s1937_s22 = scalar_lea.hbm %s3131_s21, %s2542_s4 }
 0x406   : > { %s1941_s0 = sshll.u32 %s1937_s22, 4  ;;  %s2316_s22 = scalar_lea.hbm %s3131_s21, 2  ;;  %s1942_s0 = int_to_ptr.hbm [resolvable:$true] %s1941_s0 }
 0x408   : > { %v1018_v26 = vpop.permute.xlu1 %1017 }
 0x409   : > { %1019 = vrot.lane.b32.xlu0 %v2685_v42, %s2396_s1 }
 0x40d   : > { %1225 = vrot.lane.b32.xlu2 %v2668_v34, %s2397_s24 }
 0x410   : > { %v1224_v30 = vpop.permute.xlu1 %1223 }
 0x411   : > { %1393 = vrot.lane.b32.xlu0 %v2668_v34, %s2400_s26 }
 0x415   : > { %1221 = vrot.lane.b32.xlu2 %v2670_v36, %s2397_s24 }
 0x418   : > { %v1216_v35 = vpop.permute.xlu1 %1215 }
 0x419   : > { %1389 = vrot.lane.b32.xlu0 %v2670_v36, %s2400_s26 }
 0x41d   : > { %1391 = vrot.lane.b32.xlu2 %v2665_v32, %s2400_s26  ;;  %s3046_s26 = sand.u32 1, %s2382_s28  }
 0x41e   : > { %s2050_s25 = sshll.u32 %s3046_s26, 4 }
 0x41f   : > { %s3056_s1 = scalar_lea.vmem [#allocation4], %s2050_s25  ;;  %s1924_s25 = scalar_lea.sflag [#allocation3], %s3046_s26 }
 0x420   : > { %v1218_v38 = vpop.permute.xlu1 %1217 }
 0x421   : > { %1219 = vrot.lane.b32.xlu0 %v2685_v42, %s2398_s5 }
 0x425   : > { %1383 = vrot.lane.b32.xlu2 %v2678_v40, %s2399_s29 }
 0x428   : > { %v1386_v50 = vpop.permute.xlu1 %1385 }
 0x42d   : > { %1387 = vrot.lane.b32.xlu2 %v2685_v42, %s2399_s29  ;;  %s679_s29 = scalar_lea.vmem [#allocation2], %s3046_s26 }
 0x42e   : > { %s1939_s2 = sshll.u32 %s679_s29, 4  ;;  %s1940_s2 = int_to_ptr.vmem [resolvable:$true] %s1939_s2 }
 0x450   : > { %v958_v9 = vpop.xlane.xlu0 %957 }
 0x451   : > { %2236 = vrcp.f32 %v958_v9 }
 0x457   : > { %v2237_v11 = vpop.eup %2236 }
 0x458   : > { %v961_v10 = vpop.xlane.xlu2 %960  ;;  %v968_v18 = vmul.f32 %v2237_v11, %v2231_v60 }
 0x459   : > { %2238 = vrcp.f32 %v961_v10 }
 0x45f   : > { %v2239_v12 = vpop.eup %2238 }
 0x460   : > { %v964_v14 = vpop.xlane.xlu2 %963  ;;  %v969_v19 = vmul.f32 %v2239_v12, %v2233_v1 }
 0x461   : > { %2240 = vrcp.f32 %v964_v14 }
 0x463   : > { %v972_v16 = vpop.permute.xlu0 %971 }
 0x464   : > { %1004 = vmatpush.msrb.mxu0 %v972_v16  ;;  %2130 = vmatpush.msra.mxu3 %v972_v16 }
 0x465   : > { %2064 = vmatmul.msk.f32.vlgmr.msrb.gmra.mxu0 %vm937_vm14, %v968_v18  ;;  %2065 = vmatmul.msk.f32.vlgmr.msra.gmra.mxu3 %vm937_vm14, %v969_v19 }
 0x466   : > { %1204 = vmatpush.msra.mxu0 %v879_v20 }
 0x467   : > { %v2241_v22 = vpop.eup %2240 }
 0x468   : > { %v1026_v23 = vpop.permute.xlu2 %1025  ;;  %v970_v25 = vmul.f32 %v2241_v22, %v2235_v4 }
 0x469   : > { %2067 = vmatpush.xpose.msk.msrb.mxu3 %vm892_vm12, %v1026_v23 }
 0x46b   : > { %v1024_v24 = vpop.permute.xlu0 %1023 }
 0x46d   : > { %2066 = vmatmul.msk.f32.gmra.mxu3 %vm937_vm14, %v970_v25 }
 0x46e   : > { %2068 = vmatpush.xpose.msk.msrb.mxu3 %vm892_vm12, %v1024_v24 }
 0x470   : > { %v1226_v27 = vpop.permute.xlu2 %1225 }
 0x472   : > { %2069 = vmatpush.xpose.msk.msrb.mxu3 %vm892_vm12, %v1022_v15 }
 0x473   : > { %v1016_v28 = vpop.permute.xlu0 %1015 }
 0x475   : > { %2070 = vmatmul.msk.f32.vlgmr.msrb.gmra.mxu3 %vm892_vm12, %v1016_v28 }
 0x476   : > { %2082 = vmatpush.xpose.msk.msra.mxu3 %vm892_vm12, %v1226_v27 }
 0x478   : > { %v1222_v31 = vpop.permute.xlu2 %1221 }
 0x47a   : > { %2083 = vmatpush.xpose.msk.msra.mxu3 %vm892_vm12, %v1224_v30 }
 0x47b   : > { %v1020_v32 = vpop.permute.xlu0 %1019 }
 0x47d   : > { %2071 = vmatmul.msk.f32.gmra.mxu3 %vm892_vm12, %v1018_v26 }
 0x47e   : > { %2084 = vmatpush.xpose.msk.msra.mxu3 %vm892_vm12, %v1222_v31 }
 0x480   : > { %v1392_v34 = vpop.permute.xlu2 %1391 }
 0x483   : > { %v1394_v33 = vpop.permute.xlu0 %1393 }
 0x484   : > { %2094 = vmatpush.xpose.msk.msrb.mxu0 %vm892_vm12, %v1394_v33 }
 0x485   : > { %2072 = vmatmul.msk.f32.gmra.mxu3 %vm892_vm12, %v1020_v32 }
 0x488   : > { %2095 = vmatpush.xpose.msk.msrb.mxu0 %vm892_vm12, %v1392_v34  ;;  %v1384_v46 = vpop.permute.xlu2 %1383 }
 0x48b   : > { %v1390_v37 = vpop.permute.xlu0 %1389 }
 0x48c   : > { %2096 = vmatpush.xpose.msk.msrb.mxu0 %vm892_vm12, %v1390_v37 }
 0x48d   : > { %2085 = vmatmul.msk.f32.vlgmr.msra.gmra.mxu3 %vm892_vm12, %v1216_v35 }
 0x490   : > { %v1388_v55 = vpop.permute.xlu2 %1387 }
 0x493   : > { %v1220_v39 = vpop.permute.xlu0 %1219 }
 0x495   : > { %2086 = vmatmul.msk.f32.gmra.mxu3 %vm892_vm12, %v1218_v38 }
 0x49d   : > { %2087 = vmatmul.msk.f32.gmra.mxu3 %vm892_vm12, %v1220_v39 }
 0x4e2   : > { %v1006_v40 = vpop.f32.mrf.mxu0 }
 0x4e3   : > { %2079 = vmatmul.msk.f32.vlgmr.msra.gmra.mxu0 %vm892_vm12, %v1006_v40 }
 0x4e8   : > { %v1009_v41 = vpop.f32.mrf.mxu3 }
 0x4eb   : > { %2080 = vmatmul.msk.f32.gmra.mxu0 %vm892_vm12, %v1009_v41 }
 0x4f0   : > { %v1012_v42 = vpop.f32.mrf.mxu3 }
 0x4f3   : > { %2081 = vmatmul.msk.f32.gmra.mxu0 %vm892_vm12, %v1012_v42 }
 0x4f8   : > { %v1056_v43 = vpop.f32.mrf.mxu3 }
 0x4f9   : > { %v1065_v45 = vsel %vm878_vm13, %v1056_v43, -1e+30 }
 0x4fa   : > { %v1068_v47 = vsel %vm937_vm14, %v1065_v45, -inf }
 0x4fb   : > { %1069 = vmax.xlane.f32.xlu0 %v1068_v47  ;;  %2097 = vmatmul.msk.f32.vlgmr.msrb.gmra.mxu0 %vm892_vm12, %v1384_v46 }
 0x500   : > { %v1059_v48 = vpop.f32.mrf.mxu3 }
 0x501   : > { %v1066_v49 = vsel %vm878_vm13, %v1059_v48, -1e+30 }
 0x502   : > { %v1071_v51 = vsel %vm937_vm14, %v1066_v49, -inf }
 0x503   : > { %1072 = vmax.xlane.f32.xlu1 %v1071_v51  ;;  %2098 = vmatmul.msk.f32.gmra.mxu0 %vm892_vm12, %v1386_v50 }
 0x508   : > { %v1062_v52 = vpop.f32.mrf.mxu3 }
 0x509   : > { %v1067_v53 = vsel %vm878_vm13, %v1062_v52, -1e+30 }
 0x50a   : > { %v1074_v56 = vsel %vm937_vm14, %v1067_v53, -inf }
 0x50b   : > { %1075 = vmax.xlane.f32.xlu2 %v1074_v56  ;;  %2099 = vmatmul.msk.f32.gmra.mxu0 %vm892_vm12, %v1388_v55 }
 0x510   : > { %v1256_v57 = vpop.f32.mrf.mxu3 }
 0x511   : > { %v1265_v58 = vsel %vm878_vm13, %v1256_v57, -1e+30 }
 0x512   : > { %v1268_v59 = vsel %vm937_vm14, %v1265_v58, -inf }
 0x513   : > { %1269 = vmax.xlane.f32.xlu0 %v1268_v59 }
 0x518   : > { %v1259_v60 = vpop.f32.mrf.mxu3 }
 0x519   : > { %v2783_v61 = vsel %vm878_vm13, %v1259_v60, -1e+30 }
 0x51a   : > { %v1271_v62 = vsel %vm937_vm14, %v2783_v61, -inf }
 0x51b   : > { %1272 = vmax.xlane.f32.xlu2 %v1271_v62 }
 0x520   : > { %v1262_v63 = vpop.f32.mrf.mxu3 }
 0x521   : > { %v2789_v0 = vsel %vm878_vm13, %v1262_v63, -1e+30 }
 0x522   : > { %v1274_v1 = vsel %vm937_vm14, %v2789_v0, -inf }
 0x523   : > { %1275 = vmax.xlane.f32.xlu1 %v1274_v1 }
 0x527   : > { %1101 = vrot.lane.b32.xlu0 %v2670_v36, %s2401_s3 }
 0x533   : > { %2206 = vrot.lane.b32.xlu2 %v2703_v54, %s2402_s30 }
 0x560   : > { %v2797_v2 = vpop.f32.mrf.mxu0 }
 0x568   : > { %v2799_v3 = vpop.f32.mrf.mxu0 }
 0x56e   : > { %v1070_v4 = vpop.xlane.xlu0 %1069 }
 0x56f   : > { %v1077_v5 = vsub.f32 %v1065_v45, %v1070_v4 }
 0x570   : > { %v2801_v6 = vpop.f32.mrf.mxu0 }
 0x571   : > { %v1080_v7 = vmul.f32 1.442695, %v1077_v5 }
 0x573   : > { %2242 = vpow2.f32 %v1080_v7 }
 0x576   : > { %v1073_v8 = vpop.xlane.xlu1 %1072 }
 0x577   : > { %v1078_v9 = vsub.f32 %v1066_v49, %v1073_v8 }
 0x578   : > { %v1424_v10 = vpop.f32.mrf.mxu0 }
 0x579   : > { %v2803_v11 = vpop.eup %2242  ;;  %v1082_v12 = vmul.f32 1.442695, %v1078_v9  ;;  %v1433_v14 = vsel %vm878_vm13, %v1424_v10, -1e+30 }
 0x57a   : > { %v1086_v15 = vsel %vm937_vm14, %v2803_v11, 0.0  ;;  %v1436_v16 = vsel %vm937_vm14, %v1433_v14, -inf }
 0x57b   : > { %2244 = vpow2.f32 %v1082_v12  ;;  %1087 = vadd.xlane.f32.xlu0 %v1086_v15  ;;  %1437 = vmax.xlane.f32.xlu1 %v1436_v16 }
 0x57e   : > { %v1076_v18 = vpop.xlane.xlu2 %1075 }
 0x57f   : > { %v1079_v22 = vsub.f32 %v1067_v53, %v1076_v18 }
 0x580   : > { %v1427_v19 = vpop.f32.mrf.mxu0 }
 0x581   : > { %v2810_v20 = vpop.eup %2244  ;;  %v1434_v23 = vsel %vm878_vm13, %v1427_v19, -1e+30  ;;  %v1084_v26 = vmul.f32 1.442695, %v1079_v22 }
 0x582   : > { %v1089_v24 = vsel %vm937_vm14, %v2810_v20, 0.0  ;;  %v1439_v25 = vsel %vm937_vm14, %v1434_v23, -inf }
 0x583   : > { %1090 = vadd.xlane.f32.xlu2 %v1089_v24  ;;  %1440 = vmax.xlane.f32.xlu0 %v1439_v25  ;;  %2246 = vpow2.f32 %v1084_v26 }
 0x586   : > { %v1270_v27 = vpop.xlane.xlu0 %1269 }
 0x587   : > { %v1277_v30 = vsub.f32 %v1265_v58, %v1270_v27 }
 0x588   : > { %v1430_v28 = vpop.f32.mrf.mxu0 }
 0x589   : > { %v1435_v31 = vsel %vm878_vm13, %v1430_v28, -1e+30  ;;  %v1280_v33 = vmul.f32 1.442695, %v1277_v30  ;;  %v2820_v35 = vpop.eup %2246 }
 0x58a   : > { %v1442_v32 = vsel %vm937_vm14, %v1435_v31, -inf  ;;  %v1092_v37 = vsel %vm937_vm14, %v2820_v35, 0.0 }
 0x58b   : > { %1443 = vmax.xlane.f32.xlu2 %v1442_v32  ;;  %2248 = vpow2.f32 %v1280_v33 }
 0x58e   : > { %v1273_v34 = vpop.xlane.xlu2 %1272 }
 0x58f   : > { %v1278_v42 = vsub.f32 %v2783_v61, %v1273_v34 }
 0x591   : > { %v2826_v39 = vpop.eup %2248  ;;  %v1282_v43 = vmul.f32 1.442695, %v1278_v42 }
 0x592   : > { %v1286_v41 = vsel %vm937_vm14, %v2826_v39, 0.0 }
 0x593   : > { %1093 = vadd.xlane.f32.xlu2 %v1092_v37  ;;  %2250 = vpow2.f32 %v1282_v43 }
 0x594   : > { %2196 = vrot.lane.b32.xlu1 %v2703_v54, %s2401_s3 }
 0x596   : > { %v2207_v38 = vpop.permute.xlu2 %2206  ;;  %v1276_v45 = vpop.xlane.xlu1 %1275 }
 0x597   : > { %v2208_v44 = vunpack.i.l.bf16 %v2207_v38  ;;  %2201 = vrot.lane.b32.xlu0 %v2703_v54, %s2403_s6  ;;  %v2209_v40 = vunpack.i.h.bf16 %v2207_v38  ;;  %v1279_v46 = vsub.f32 %v2789_v0, %v1276_v45 }
 0x599   : > { %1500 = vmatpush.msrb.mxu3 %v2208_v44  ;;  %v1284_v47 = vmul.f32 1.442695, %v1279_v46  ;;  %v2834_v48 = vpop.eup %2250  ;;  %v1102_v51 = vpop.permute.xlu0 %1101  ;;  %v881_v44 = vld [vmem:[%s3176_s7 + $0x10] sm:$0xff] }
 0x59a   : > { %v1289_v54 = vsel %vm937_vm14, %v2834_v48, 0.0 }
 0x59b   : > { %1501 = vmatpush.msrb.mxu3 %v2209_v40  ;;  %1287 = vadd.xlane.f32.xlu2 %v1286_v41  ;;  %2252 = vpow2.f32 %v1284_v47 }
 0x5a1   : > { %v2838_v49 = vpop.eup %2252 }
 0x5a2   : > { %v1292_v50 = vsel %vm937_vm14, %v2838_v49, 0.0 }
 0x5b3   : > { %1301 = vrot.lane.b32.xlu2 %v2670_v36, %s2403_s6  ;;  %s2310_s6 = sshra.s32 %s1942_s0, 4  ;;  %s2311_s6 = int_to_ptr.hbm [resolvable:$true] %s2310_s6 }
 0x5b4   : > { %p2317_p0 = scmp.lt.s32.totalorder %s2311_s6, %s3131_s21 }
 0x5c1   : > { %1290 = vadd.xlane.f32.xlu0 %v1289_v54 }
 0x5c9   : > { %1293 = vadd.xlane.f32.xlu0 %v1292_v50 }
 0x5ee   : > { %v1088_v52 = vpop.xlane.xlu0 %1087  ;;  %v1438_v53 = vpop.xlane.xlu1 %1437 }
 0x5ef   : > { %v1445_v55 = vsub.f32 %v1433_v14, %v1438_v53 }
 0x5f1   : > { %v1448_v56 = vmul.f32 1.442695, %v1445_v55 }
 0x5f3   : > { %2254 = vpow2.f32 %v1448_v56 }
 0x5f6   : > { %v1091_v57 = vpop.xlane.xlu2 %1090  ;;  %v1441_v58 = vpop.xlane.xlu0 %1440 }
 0x5f7   : > { %v1446_v59 = vsub.f32 %v1434_v23, %v1441_v58 }
 0x5f9   : > { %v2842_v60 = vpop.eup %2254  ;;  %v1450_v61 = vmul.f32 1.442695, %v1446_v59 }
 0x5fa   : > { %v1454_v62 = vsel %vm937_vm14, %v2842_v60, 0.0 }
 0x5fb   : > { %2256 = vpow2.f32 %v1450_v61  ;;  %1455 = vadd.xlane.f32.xlu1 %v1454_v62 }
 0x5fc   : > { %2258 = vrcp.f32 %v1088_v52 }
 0x5fe   : > { %v1444_v63 = vpop.xlane.xlu2 %1443 }
 0x5ff   : > { %v1447_v0 = vsub.f32 %v1435_v31, %v1444_v63 }
 0x601   : > { %v2846_v1 = vpop.eup %2256  ;;  %v1452_v4 = vmul.f32 1.442695, %v1447_v0 }
 0x602   : > { %v1457_v5 = vsel %vm937_vm14, %v2846_v1, 0.0  ;;  %v2259_v10 = vpop.eup %2258 }
 0x603   : > { %2260 = vpow2.f32 %v1452_v4  ;;  %1458 = vadd.xlane.f32.xlu2 %v1457_v5  ;;  %v1098_v18 = vmul.f32 %v2259_v10, %v2803_v11  ;;  %v2213_v4 = vld [vmem:[%s3177_s8] ss:$0 sm:$0xff] }
 0x604   : > { %2262 = vrcp.f32 %v1091_v57 }
 0x606   : > { %v2197_v7 = vpop.permute.xlu1 %2196  ;;  %v1094_v8 = vpop.xlane.xlu2 %1093 }
 0x607   : > { %v2198_v9 = vunpack.i.l.bf16 %v2197_v7  ;;  %v2199_v14 = vunpack.i.h.bf16 %v2197_v7  ;;  %2264 = vrcp.f32 %v1094_v8 }
 0x609   : > { %v2850_v12 = vpop.eup %2260  ;;  %1132 = vmatpush.msrb.mxu1 %v2198_v9  ;;  %v2202_v15 = vpop.permute.xlu0 %2201 }
 0x60a   : > { %v1460_v16 = vsel %vm937_vm14, %v2850_v12, 0.0  ;;  %v2203_v19 = vunpack.i.l.bf16 %v2202_v15  ;;  %v2204_v23 = vunpack.i.h.bf16 %v2202_v15  ;;  %v2263_v24 = vpop.eup %2262 }
 0x60b   : > { %1133 = vmatpush.msrb.mxu1 %v2199_v14  ;;  %1461 = vadd.xlane.f32.xlu0 %v1460_v16  ;;  %v1099_v25 = vmul.f32 %v2263_v24, %v2810_v20 }
 0x60d   : > { %1134 = vmatpush.msrb.mxu1 %v1102_v51  ;;  %v2265_v11 = vpop.eup %2264  ;;  %v882_v51 = vld [vmem:[%s3176_s7 + $0x18] sm:$0xff] }
 0x60e   : > { %2073 = vmatmul.msk.f32.vlgmr.msrb.gmra.mxu1 %vm937_vm14, %v1098_v18  ;;  %v1288_v22 = vpop.xlane.xlu2 %1287  ;;  %v1100_v27 = vmul.f32 %v2265_v11, %v2820_v35  ;;  %v880_v35 = vld [vmem:[%s3176_s7 + $0x8] sm:$0xff]  ;;  %s2312_s7 = scalar_lea.hbm %s2311_s6, 1 }
 0x60f   : > { %1332 = vmatpush.msra.mxu1 %v2203_v19  ;;  %2266 = vrcp.f32 %v1288_v22  ;;  %1169 = vmatpush.msra.mxu2 %v880_v35  ;;  %p2313_p11 = scmp.ne.s32.totalorder %s2311_s6, %s2312_s7  ;;  %p2318_p1 = scmp.lt.s32.totalorder %s2316_s22, %s2312_s7 }
 0x611   : > { %1333 = vmatpush.msra.mxu1 %v2204_v23  ;;  %1369 = vmatpush.msrb.mxu2 %v881_v44  ;;  %v1642_v44 = vld [vmem:[%s3121_s11 + $0x8] sm:$0xff]  ;;  %p2314_p12 = pnand %p2313_p11, %p2559_p5  ;;  %p2319_p2 = por %p2318_p1, %p2317_p0 }
 0x613   : > { %p2315_p13 = pneg %p2314_p12 }
 0x614   : > { %1469 = vrot.lane.b32.xlu1 %v2670_v36, %s2402_s30  ;;  %s2123_s30 = sshll.u32 %s2542_s4, 4 }
 0x615   : > { %v2267_v28 = vpop.eup %2266  ;;  %p2320_p3 = pnand %p2319_p2, %p2315_p13 }
 0x616   : > { %2074 = vmatmul.msk.f32.gmra.mxu1 %vm937_vm14, %v1099_v25  ;;  %v1302_v26 = vpop.permute.xlu2 %1301  ;;  %v1298_v30 = vmul.f32 %v2267_v28, %v2826_v39 }
 0x617   : > { %1334 = vmatpush.msra.mxu1 %v1302_v26 }
 0x619   : > { %1537 = vmatpush.msrb.mxu1 %v882_v51 }
 0x61e   : > { %2075 = vmatmul.msk.f32.gmra.mxu1 %vm937_vm14, %v1100_v27 }
 0x626   : > { %2088 = vmatmul.msk.f32.vlgmr.msra.gmra.mxu1 %vm937_vm14, %v1298_v30 }
 0x634   : > { %v1291_v31 = vpop.xlane.xlu0 %1290 }
 0x635   : > { %2268 = vrcp.f32 %v1291_v31 }
 0x63b   : > { %v2269_v36 = vpop.eup %2268 }
 0x63c   : > { %v1294_v32 = vpop.xlane.xlu0 %1293  ;;  %v1299_v20 = vmul.f32 %v2269_v36, %v2834_v48 }
 0x63d   : > { %2270 = vrcp.f32 %v1294_v32 }
 0x63e   : > { %2089 = vmatmul.msk.f32.gmra.mxu1 %vm937_vm14, %v1299_v20 }
 0x643   : > { %v2271_v33 = vpop.eup %2270 }
 0x644   : > { %v1300_v34 = vmul.f32 %v2271_v33, %v2838_v49 }
 0x646   : > { %2090 = vmatmul.msk.f32.gmra.mxu1 %vm937_vm14, %v1300_v34 }
 0x66e   : > { %v1456_v37 = vpop.xlane.xlu1 %1455 }
 0x66f   : > { %2272 = vrcp.f32 %v1456_v37 }
 0x675   : > { %v2273_v39 = vpop.eup %2272 }
 0x676   : > { %v1459_v38 = vpop.xlane.xlu2 %1458  ;;  %v1466_v40 = vmul.f32 %v2273_v39, %v2842_v60  ;;  %v1643_v39 = vld [vmem:[%s3121_s11 + $0x10] sm:$0xff] }
 0x677   : > { %2274 = vrcp.f32 %v1459_v38  ;;  %v1644_v38 = vld [vmem:[%s3121_s11 + $0x18] sm:$0xff] }
 0x67d   : > { %v2275_v43 = vpop.eup %2274 }
 0x67e   : > { %v1462_v42 = vpop.xlane.xlu0 %1461  ;;  %v1467_v46 = vmul.f32 %v2275_v43, %v2846_v1 }
 0x67f   : > { %2276 = vrcp.f32 %v1462_v42 }
 0x685   : > { %v2277_v47 = vpop.eup %2276 }
 0x686   : > { %v1470_v41 = vpop.permute.xlu1 %1469  ;;  %v1468_v54 = vmul.f32 %v2277_v47, %v2850_v12 }
 0x687   : > { %1502 = vmatpush.msrb.mxu3 %v1470_v41 }
 0x688   : > { %2100 = vmatmul.msk.f32.vlgmr.msrb.gmra.mxu3 %vm937_vm14, %v1466_v40  ;;  %v1641_v40 = vld [vmem:[%s3121_s11] sm:$0xff] }
 0x68b   : > { %v1136_v45 = vpop.f32.mrf.mxu1 }
 0x68c   : > { %2076 = vmatmul.msk.f32.vlgmr.msra.gmra.mxu2 %vm892_vm12, %v1136_v45 }
 0x68d   : > { %1670 = vmatpush.msra.mxu2 %v1644_v38 }
 0x68f   : > { %1671 = vmatpush.msra.mxu2 %v1643_v39 }
 0x690   : > { %2101 = vmatmul.msk.f32.gmra.mxu3 %vm937_vm14, %v1467_v46 }
 0x691   : > { %1672 = vmatpush.msra.mxu2 %v1642_v44 }
 0x693   : > { %v1139_v48 = vpop.f32.mrf.mxu1  ;;  %1673 = vmatpush.msra.mxu2 %v1641_v40 }
 0x694   : > { %2077 = vmatmul.msk.f32.gmra.mxu2 %vm892_vm12, %v1139_v48 }
 0x698   : > { %2102 = vmatmul.msk.f32.gmra.mxu3 %vm937_vm14, %v1468_v54 }
 0x69b   : > { %v1142_v49 = vpop.f32.mrf.mxu1 }
 0x69c   : > { %2078 = vmatmul.msk.f32.gmra.mxu2 %vm892_vm12, %v1142_v49 }
 0x6a3   : > { %v1336_v50 = vpop.f32.mrf.mxu1 }
 0x6a4   : > { %2091 = vmatmul.msk.f32.vlgmr.msrb.gmra.mxu2 %vm892_vm12, %v1336_v50 }
 0x6bb   : > { %v1339_v52 = vpop.f32.mrf.mxu1 }
 0x6bc   : > { %2092 = vmatmul.msk.f32.gmra.mxu2 %vm892_vm12, %v1339_v52 }
 0x6c3   : > { %v1342_v53 = vpop.f32.mrf.mxu1 }
 0x6c4   : > { %2093 = vmatmul.msk.f32.gmra.mxu2 %vm892_vm12, %v1342_v53 }
 0x70b   : > { %v1504_v55 = vpop.f32.mrf.mxu3 }
 0x70c   : > { %2103 = vmatmul.msk.f32.vlgmr.msrb.gmra.mxu1 %vm892_vm12, %v1504_v55 }
 0x70f   : > { %v1171_v58 = vpop.f32.mrf.mxu2 }
 0x710   : > { %v1207_v62 = vadd.f32 %v2797_v2, %v1171_v58 }
 0x713   : > { %v1507_v56 = vpop.f32.mrf.mxu3 }
 0x714   : > { %2104 = vmatmul.msk.f32.gmra.mxu1 %vm892_vm12, %v1507_v56 }
 0x717   : > { %v1174_v59 = vpop.f32.mrf.mxu2 }
 0x718   : > { %v1210_v8 = vadd.f32 %v2799_v3, %v1174_v59  ;;  %v2214_v59 = vld [vmem:[%s3178_s9] ss:$0 sm:$0xff] }
 0x71b   : > { %v1510_v57 = vpop.f32.mrf.mxu3 }
 0x71c   : > { %2105 = vmatmul.msk.f32.gmra.mxu1 %vm892_vm12, %v1510_v57 }
 0x71f   : > { %v1177_v60 = vpop.f32.mrf.mxu2 }
 0x720   : > { %v1213_v18 = vadd.f32 %v2801_v6, %v1177_v60 }
 0x727   : > { %v1371_v61 = vpop.f32.mrf.mxu2 }
 0x728   : > { %v1380_v63 = vadd.f32 %v1371_v61, %v1207_v62 }
 0x73f   : > { %v1374_v5 = vpop.f32.mrf.mxu2 }
 0x740   : > { %v1381_v10 = vadd.f32 %v1374_v5, %v1210_v8 }
 0x747   : > { %v1377_v16 = vpop.f32.mrf.mxu2 }
 0x748   : > { %v1382_v22 = vadd.f32 %v1377_v16, %v1213_v18 }
 0x789   : > { %v1539_v0 = vpop.f32.mrf.mxu1 }
 0x78a   : > { %v1548_v1 = vadd.f32 %v1539_v0, %v1380_v63  ;;  %v2215_v63 = vld [vmem:[%s3179_s10] ss:$0 sm:$0xff] }
 0x78c   : > { %v1551_v7 = vadd.f32 %v1548_v1, %v2604_v13 }
 0x78e   : > { %v2898_v9 = vadd.f32 %v2213_v4, %v1551_v7 }
 0x790   : > { %v1561_v12 = vsel %vm742_vm1, %v2898_v9, 0.0 }
 0x791   : > { %1562 = vadd.xlane.f32.xlu0 %v1561_v12  ;;  %v1542_v2 = vpop.f32.mrf.mxu1 }
 0x792   : > { %v1549_v14 = vadd.f32 %v1542_v2, %v1381_v10 }
 0x794   : > { %v1552_v15 = vadd.f32 %v1549_v14, %v2611_v17 }
 0x796   : > { %v2904_v19 = vadd.f32 %v2213_v4, %v1552_v15 }
 0x798   : > { %v1564_v13 = vsel %vm742_vm1, %v2904_v19, 0.0 }
 0x799   : > { %1565 = vadd.xlane.f32.xlu1 %v1564_v13  ;;  %v1545_v3 = vpop.f32.mrf.mxu1 }
 0x79a   : > { %v1550_v23 = vadd.f32 %v1545_v3, %v1382_v22 }
 0x79c   : > { %v1553_v24 = vadd.f32 %v1550_v23, %v2618_v21 }
 0x79e   : > { %v2909_v25 = vadd.f32 %v2213_v4, %v1553_v24 }
 0x7a0   : > { %v1567_v26 = vsel %vm742_vm1, %v2909_v25, 0.0 }
 0x7a1   : > { %1568 = vadd.xlane.f32.xlu0 %v1567_v26 }
 0x804   : > { %v1563_v17 = vpop.xlane.xlu0 %1562 }
 0x805   : > { %v1570_v6 = vmul.f32 %v1563_v17, %v2622_v29  ;;  %v1718_v17 = vld [vmem:[%s3123_s13 + $0x38] sm:$0xff] }
 0x806   : > { %1740 = vmatpush.msra.mxu0 %v1718_v17 }
 0x807   : > { %v1573_v11 = vsub.f32 %v2898_v9, %v1570_v6  ;;  %v1717_v6 = vld [vmem:[%s3123_s13 + $0x30] sm:$0xff] }
 0x808   : > { %1741 = vmatpush.msra.mxu0 %v1717_v6 }
 0x809   : > { %v1576_v27 = vmul.f32 %v1573_v11, %v1573_v11 }
 0x80b   : > { %v1579_v28 = vsel %vm742_vm1, %v1576_v27, 0.0  ;;  %v1715_v27 = vld [vmem:[%s3123_s13 + $0x20] sm:$0xff] }
 0x80c   : > { %1580 = vadd.xlane.f32.xlu2 %v1579_v28  ;;  %v1566_v30 = vpop.xlane.xlu1 %1565  ;;  %v1714_v28 = vld [vmem:[%s3123_s13 + $0x18] sm:$0xff] }
 0x80d   : > { %v1571_v31 = vmul.f32 %v1566_v30, %v2622_v29  ;;  %v1713_v30 = vld [vmem:[%s3123_s13 + $0x10] sm:$0xff] }
 0x80f   : > { %v1574_v21 = vsub.f32 %v2904_v19, %v1571_v31  ;;  %v1712_v31 = vld [vmem:[%s3123_s13 + $0x8] sm:$0xff] }
 0x811   : > { %v1577_v36 = vmul.f32 %v1574_v21, %v1574_v21 }
 0x813   : > { %v1582_v32 = vsel %vm742_vm1, %v1577_v36, 0.0  ;;  %v2216_v36 = vld [vmem:[%s3122_s12] ss:$0 sm:$0xff] }
 0x814   : > { %1583 = vadd.xlane.f32.xlu0 %v1582_v32  ;;  %v1569_v20 = vpop.xlane.xlu0 %1568 }
 0x815   : > { %v1572_v33 = vmul.f32 %v1569_v20, %v2622_v29 }
 0x817   : > { %v2921_v34 = vsub.f32 %v2909_v25, %v1572_v33 }
 0x819   : > { %v1578_v35 = vmul.f32 %v2921_v34, %v2921_v34 }
 0x81b   : > { %v1585_v37 = vsel %vm742_vm1, %v1578_v35, 0.0 }
 0x81c   : > { %1586 = vadd.xlane.f32.xlu2 %v1585_v37 }
 0x87f   : > { %v1581_v41 = vpop.xlane.xlu2 %1580 }
 0x880   : > { %v1588_v42 = vmul.f32 %v1581_v41, %v2622_v29 }
 0x882   : > { %v1591_v43 = vadd.f32 1e-06, %v1588_v42 }
 0x884   : > { %2278 = vrsqrt.f32 %v1591_v43  ;;  %vm1600_vm2 = vweird.f32 %v1591_v43 }
 0x887   : > { %v1584_v45 = vpop.xlane.xlu0 %1583 }
 0x888   : > { %v1589_v46 = vmul.f32 %v1584_v45, %v2622_v29 }
 0x88a   : > { %v2279_v47 = vpop.eup %2278  ;;  %v1592_v48 = vadd.f32 1e-06, %v1589_v46 }
 0x88b   : > { %v1595_v54 = vmul.f32 %v2279_v47, %v1591_v43  ;;  %vm1601_vm15 = vweird.f32 %v2279_v47 }
 0x88c   : > { %2280 = vrsqrt.f32 %v1592_v48  ;;  %vm1602_vm3 = vmor %vm1600_vm2, %vm1601_vm15  ;;  %vm1610_vm5 = vweird.f32 %v1592_v48 }
 0x88d   : > { %v1596_v49 = vmul.f32 %v2279_v47, %v1595_v54 }
 0x88f   : > { %v1597_v50 = vmul.f32 0.5, %v1596_v49  ;;  %v1587_v51 = vpop.xlane.xlu2 %1586 }
 0x890   : > { %v1590_v52 = vmul.f32 %v1587_v51, %v2622_v29 }
 0x891   : > { %v1598_v53 = vsub.f32 1.5, %v1597_v50 }
 0x892   : > { %v2281_v55 = vpop.eup %2280  ;;  %v1593_v56 = vadd.f32 1e-06, %v1590_v52 }
 0x893   : > { %v1599_v57 = vmul.f32 %v2279_v47, %v1598_v53  ;;  %v1605_v58 = vmul.f32 %v2281_v55, %v1592_v48  ;;  %vm1611_vm4 = vweird.f32 %v2281_v55 }
 0x894   : > { %2282 = vrsqrt.f32 %v1593_v56  ;;  %vm1612_vm6 = vmor %vm1610_vm5, %vm1611_vm4  ;;  %vm1620_vm8 = vweird.f32 %v1593_v56  ;;  %vm1918_vm5 = vcmask 523265  }
 0x895   : > { %v1603_v60 = vsel %vm1602_vm3, %v2279_v47, %v1599_v57  ;;  %v1606_v61 = vmul.f32 %v2281_v55, %v1605_v58 }
 0x896   : > { %v1624_v62 = vmul.f32 %v1603_v60, %v1573_v11  ;;  %v1716_v11 = vld [vmem:[%s3123_s13 + $0x28] sm:$0xff] }
 0x897   : > { %v1607_v0 = vmul.f32 0.5, %v1606_v61  ;;  %1742 = vmatpush.msra.mxu0 %v1716_v11 }
 0x898   : > { %v1631_v1 = vmul.f32 %v2214_v59, %v1624_v62 }
 0x899   : > { %v1608_v4 = vsub.f32 1.5, %v1607_v0  ;;  %1743 = vmatpush.msra.mxu0 %v1715_v27 }
 0x89a   : > { %v2283_v5 = vpop.eup %2282  ;;  %v1638_v7 = vadd.f32 %v2215_v63, %v1631_v1  ;;  %v2217_v1 = vld [vmem:[%s3124_s14] ss:$0 sm:$0xff] }
 0x89b   : > { %v1609_v8 = vmul.f32 %v2281_v55, %v1608_v4  ;;  %v1615_v10 = vmul.f32 %v2283_v5, %v1593_v56  ;;  %vm1621_vm7 = vweird.f32 %v2283_v5  ;;  %1744 = vmatpush.msra.mxu0 %v1714_v28 }
 0x89c   : > { %2106 = vmatmul.msk.f32.vlgmr.msra.gmra.mxu2 %vm742_vm1, %v1638_v7  ;;  %vm1622_vm9 = vmor %vm1620_vm8, %vm1621_vm7 }
 0x89d   : > { %v1613_v12 = vsel %vm1612_vm6, %v2281_v55, %v1609_v8  ;;  %v1616_v2 = vmul.f32 %v2283_v5, %v1615_v10  ;;  %1745 = vmatpush.msra.mxu0 %v1713_v30 }
 0x89e   : > { %v1625_v14 = vmul.f32 %v1613_v12, %v1574_v21  ;;  %v1711_v21 = vld [vmem:[%s3123_s13] sm:$0xff] }
 0x89f   : > { %v1617_v15 = vmul.f32 0.5, %v1616_v2  ;;  %1746 = vmatpush.msra.mxu0 %v1712_v31 }
 0x8a0   : > { %v1632_v16 = vmul.f32 %v2214_v59, %v1625_v14 }
 0x8a1   : > { %v1618_v18 = vsub.f32 1.5, %v1617_v15  ;;  %1747 = vmatpush.msra.mxu0 %v1711_v21  ;;  %v1844_v21 = vld [vmem:[%s3127_s17 + $0x18] sm:$0xff] }
 0x8a2   : > { %v1639_v22 = vadd.f32 %v2215_v63, %v1632_v16  ;;  %1870 = vmatpush.msra.mxu3 %v1844_v21 }
 0x8a3   : > { %v1619_v13 = vmul.f32 %v2283_v5, %v1618_v18 }
 0x8a4   : > { %2107 = vmatmul.msk.f32.gmra.mxu2 %vm742_vm1, %v1639_v22 }
 0x8a5   : > { %v1623_v3 = vsel %vm1622_vm9, %v2283_v5, %v1619_v13 }
 0x8a6   : > { %v1626_v23 = vmul.f32 %v1623_v3, %v2921_v34 }
 0x8a8   : > { %v1633_v24 = vmul.f32 %v2214_v59, %v1626_v23 }
 0x8aa   : > { %v1640_v26 = vadd.f32 %v2215_v63, %v1633_v24 }
 0x8ac   : > { %2108 = vmatmul.msk.f32.gmra.mxu2 %vm742_vm1, %v1640_v26 }
 0x91f   : > { %v1675_v32 = vpop.f32.mrf.mxu2 }
 0x920   : > { %v1676_v20 = vadd.f32 %v2216_v36, %v1675_v32  ;;  %v1843_v32 = vld [vmem:[%s3127_s17 + $0x10] sm:$0xff] }
 0x921   : > { %1871 = vmatpush.msra.mxu3 %v1843_v32 }
 0x922   : > { %v1684_v33 = vmul.f32 %v1676_v20, %v1676_v20 }
 0x924   : > { %v1687_v34 = vmul.f32 %v1684_v33, %v1676_v20  ;;  %v1842_v33 = vld [vmem:[%s3127_s17 + $0x8] sm:$0xff] }
 0x925   : > { %1872 = vmatpush.msra.mxu3 %v1842_v33 }
 0x926   : > { %v1690_v35 = vmul.f32 0.044715, %v1687_v34  ;;  %v1885_v34 = vld [vmem:[%s3129_s19 + $0x8] sm:$0xff] }
 0x927   : > { %v1678_v37 = vpop.f32.mrf.mxu2 }
 0x928   : > { %v1693_v38 = vadd.f32 %v1690_v35, %v1676_v20  ;;  %v1679_v39 = vadd.f32 %v2216_v36, %v1678_v37  ;;  %v1841_v35 = vld [vmem:[%s3127_s17] sm:$0xff] }
 0x929   : > { %v1884_v37 = vld [vmem:[%s3129_s19] sm:$0xff]  ;;  %1873 = vmatpush.msra.mxu3 %v1841_v35 }
 0x92a   : > { %v1696_v44 = vmul.f32 0.7978846, %v1693_v38  ;;  %v1685_v40 = vmul.f32 %v1679_v39, %v1679_v39 }
 0x92c   : > { %2284 = vtanh.f32 %v1696_v44  ;;  %v1688_v41 = vmul.f32 %v1685_v40, %v1679_v39 }
 0x92e   : > { %v1691_v42 = vmul.f32 0.044715, %v1688_v41 }
 0x92f   : > { %v1681_v43 = vpop.f32.mrf.mxu2 }
 0x930   : > { %v1694_v45 = vadd.f32 %v1691_v42, %v1679_v39  ;;  %v1682_v46 = vadd.f32 %v2216_v36, %v1681_v43  ;;  %v1887_v36 = vld [vmem:[%s3129_s19 + $0x18] sm:$0xff] }
 0x931   : > { %1904 = vmatpush.msra.mxu1 %v1887_v36 }
 0x932   : > { %v2285_v47 = vpop.eup %2284  ;;  %v1686_v48 = vmul.f32 %v1682_v46, %v1682_v46  ;;  %v1697_v54 = vmul.f32 0.7978846, %v1694_v45 }
 0x933   : > { %v1702_v49 = vadd.f32 1.0, %v2285_v47 }
 0x934   : > { %v1689_v50 = vmul.f32 %v1686_v48, %v1682_v46  ;;  %2286 = vtanh.f32 %v1697_v54 }
 0x935   : > { %v1705_v51 = vmul.f32 0.5, %v1702_v49 }
 0x936   : > { %v1692_v52 = vmul.f32 0.044715, %v1689_v50 }
 0x937   : > { %v1708_v53 = vmul.f32 %v1705_v51, %v1676_v20  ;;  %v1886_v20 = vld [vmem:[%s3129_s19 + $0x10] sm:$0xff] }
 0x938   : > { %v1695_v55 = vadd.f32 %v1692_v52, %v1682_v46  ;;  %1905 = vmatpush.msra.mxu1 %v1886_v20 }
 0x939   : > { %2109 = vmatmul.msk.f32.vlgmr.msra.gmra.mxu0 %vm706_vm0, %v1708_v53 }
 0x93a   : > { %v2287_v56 = vpop.eup %2286  ;;  %v1698_v57 = vmul.f32 0.7978846, %v1695_v55  ;;  %1906 = vmatpush.msra.mxu1 %v1885_v34  ;;  %v2218_v55 = vld [vmem:[%s3125_s15] ss:$0 sm:$0xff] }
 0x93b   : > { %v1703_v58 = vadd.f32 1.0, %v2287_v56 }
 0x93c   : > { %2288 = vtanh.f32 %v1698_v57  ;;  %1907 = vmatpush.msra.mxu1 %v1884_v37 }
 0x93d   : > { %v1706_v59 = vmul.f32 0.5, %v1703_v58 }
 0x93f   : > { %v1709_v60 = vmul.f32 %v1706_v59, %v1679_v39 }
 0x941   : > { %2110 = vmatmul.msk.f32.gmra.mxu0 %vm706_vm0, %v1709_v60 }
 0x942   : > { %v2289_v61 = vpop.eup %2288 }
 0x943   : > { %v1704_v62 = vadd.f32 1.0, %v2289_v61 }
 0x945   : > { %v1707_v63 = vmul.f32 0.5, %v1704_v62 }
 0x947   : > { %v1710_v0 = vmul.f32 %v1707_v63, %v1682_v46 }
 0x949   : > { %2111 = vmatmul.msk.f32.gmra.mxu0 %vm706_vm0, %v1710_v0 }
 0x9b6   : > { %v1749_v4 = vpop.f32.mrf.mxu0 }
 0x9b7   : > { %v1750_v5 = vadd.f32 %v2217_v1, %v1749_v4 }
 0x9b9   : > { %v1758_v7 = vadd.f32 %v1750_v5, %v2898_v9 }
 0x9bb   : > { %v1761_v8 = vsel %vm742_vm1, %v1758_v7, 0.0 }
 0x9bc   : > { %1762 = vadd.xlane.f32.xlu0 %v1761_v8 }
 0x9be   : > { %v1752_v10 = vpop.f32.mrf.mxu0 }
 0x9bf   : > { %v1753_v12 = vadd.f32 %v2217_v1, %v1752_v10 }
 0x9c1   : > { %v1759_v2 = vadd.f32 %v1753_v12, %v2904_v19 }
 0x9c3   : > { %v1764_v14 = vsel %vm742_vm1, %v1759_v2, 0.0 }
 0x9c4   : > { %1765 = vadd.xlane.f32.xlu2 %v1764_v14 }
 0x9c6   : > { %v1755_v15 = vpop.f32.mrf.mxu0 }
 0x9c7   : > { %v1756_v16 = vadd.f32 %v2217_v1, %v1755_v15 }
 0x9c9   : > { %v1760_v18 = vadd.f32 %v1756_v16, %v2909_v25 }
 0x9cb   : > { %v1767_v22 = vsel %vm742_vm1, %v1760_v18, 0.0 }
 0x9cc   : > { %1768 = vadd.xlane.f32.xlu0 %v1767_v22 }
 0xa2f   : > { %v1763_v13 = vpop.xlane.xlu0 %1762 }
 0xa30   : > { %v1770_v9 = vmul.f32 %v1763_v13, %v2622_v29  ;;  %v2220_v13 = vld [vmem:[%s3130_s20] ss:$0 sm:$0xff] }
 0xa32   : > { %v1773_v3 = vsub.f32 %v1758_v7, %v1770_v9 }
 0xa34   : > { %v1776_v23 = vmul.f32 %v1773_v3, %v1773_v3 }
 0xa36   : > { %v1779_v24 = vsel %vm742_vm1, %v1776_v23, 0.0  ;;  %v2221_v23 = vld [vmem:[%s3128_s18] ss:$0 sm:$0xff] }
 0xa37   : > { %1780 = vadd.xlane.f32.xlu2 %v1779_v24  ;;  %v1766_v26 = vpop.xlane.xlu2 %1765 }
 0xa38   : > { %v1771_v19 = vmul.f32 %v1766_v26, %v2622_v29 }
 0xa3a   : > { %v2993_v17 = vsub.f32 %v1759_v2, %v1771_v19 }
 0xa3c   : > { %v1777_v6 = vmul.f32 %v2993_v17, %v2993_v17 }
 0xa3e   : > { %v1782_v25 = vsel %vm742_vm1, %v1777_v6, 0.0 }
 0xa3f   : > { %v1769_v11 = vpop.xlane.xlu0 %1768  ;;  %1783 = vadd.xlane.f32.xlu0 %v1782_v25 }
 0xa40   : > { %v1772_v27 = vmul.f32 %v1769_v11, %v2622_v29 }
 0xa42   : > { %v2999_v28 = vsub.f32 %v1760_v18, %v1772_v27 }
 0xa44   : > { %v1778_v30 = vmul.f32 %v2999_v28, %v2999_v28 }
 0xa46   : > { %v1785_v31 = vsel %vm742_vm1, %v1778_v30, 0.0 }
 0xa47   : > { %1786 = vadd.xlane.f32.xlu2 %v1785_v31 }
 0xaaa   : > { %v1781_v38 = vpop.xlane.xlu2 %1780 }
 0xaab   : > { %v1788_v39 = vmul.f32 %v1781_v38, %v2622_v29 }
 0xaad   : > { %v1791_v44 = vadd.f32 1e-06, %v1788_v39 }
 0xaaf   : > { %2290 = vrsqrt.f32 %v1791_v44  ;;  %vm1800_vm11 = vweird.f32 %v1791_v44 }
 0xab2   : > { %v1784_v40 = vpop.xlane.xlu0 %1783 }
 0xab3   : > { %v1789_v41 = vmul.f32 %v1784_v40, %v2622_v29 }
 0xab5   : > { %v2291_v42 = vpop.eup %2290  ;;  %v1792_v43 = vadd.f32 1e-06, %v1789_v41 }
 0xab6   : > { %v1795_v45 = vmul.f32 %v2291_v42, %v1791_v44  ;;  %vm1801_vm10 = vweird.f32 %v2291_v42 }
 0xab7   : > { %2292 = vrsqrt.f32 %v1792_v43  ;;  %vm1802_vm12 = vmor %vm1800_vm11, %vm1801_vm10  ;;  %vm1810_vm14 = vweird.f32 %v1792_v43 }
 0xab8   : > { %v1796_v46 = vmul.f32 %v2291_v42, %v1795_v45 }
 0xaba   : > { %v1797_v47 = vmul.f32 0.5, %v1796_v46  ;;  %v1787_v48 = vpop.xlane.xlu2 %1786 }
 0xabb   : > { %v1790_v54 = vmul.f32 %v1787_v48, %v2622_v29  ;;  %v2219_v29 = vld [vmem:[%s3126_s16] ss:$0 sm:$0xff] }
 0xabc   : > { %v1798_v49 = vsub.f32 1.5, %v1797_v47 }
 0xabd   : > { %v2293_v50 = vpop.eup %2292  ;;  %v1793_v51 = vadd.f32 1e-06, %v1790_v54 }
 0xabe   : > { %v1799_v52 = vmul.f32 %v2291_v42, %v1798_v49  ;;  %v1805_v53 = vmul.f32 %v2293_v50, %v1792_v43  ;;  %vm1811_vm13 = vweird.f32 %v2293_v50 }
 0xabf   : > { %2294 = vrsqrt.f32 %v1793_v51  ;;  %vm1812_vm15 = vmor %vm1810_vm14, %vm1811_vm13  ;;  %vm1820_vm3 = vweird.f32 %v1793_v51 }
 0xac0   : > { %v1803_v56 = vsel %vm1802_vm12, %v2291_v42, %v1799_v52  ;;  %v1806_v57 = vmul.f32 %v2293_v50, %v1805_v53 }
 0xac1   : > { %v1824_v58 = vmul.f32 %v1803_v56, %v1773_v3 }
 0xac2   : > { %v1807_v59 = vmul.f32 0.5, %v1806_v57 }
 0xac3   : > { %v1831_v60 = vmul.f32 %v2218_v55, %v1824_v58 }
 0xac4   : > { %v1808_v61 = vsub.f32 1.5, %v1807_v59 }
 0xac5   : > { %v2295_v62 = vpop.eup %2294  ;;  %v1838_v63 = vadd.f32 %v2219_v29, %v1831_v60 }
 0xac6   : > { %v1809_v0 = vmul.f32 %v2293_v50, %v1808_v61  ;;  %v1815_v1 = vmul.f32 %v2295_v62, %v1793_v51  ;;  %vm1821_vm2 = vweird.f32 %v2295_v62 }
 0xac7   : > { %2112 = vmatmul.msk.f32.vlgmr.msra.gmra.mxu3 %vm742_vm1, %v1838_v63  ;;  %2115 = vmatmul.msk.f32.vlgmr.msra.gmra.mxu1 %vm742_vm1, %v1838_v63  ;;  %vm1822_vm4 = vmor %vm1820_vm3, %vm1821_vm2 }
 0xac8   : > { %v1813_v4 = vsel %vm1812_vm15, %v2293_v50, %v1809_v0  ;;  %v1816_v5 = vmul.f32 %v2295_v62, %v1815_v1 }
 0xac9   : > { %v1825_v7 = vmul.f32 %v1813_v4, %v2993_v17 }
 0xaca   : > { %v1817_v8 = vmul.f32 0.5, %v1816_v5 }
 0xacb   : > { %v1832_v10 = vmul.f32 %v2218_v55, %v1825_v7 }
 0xacc   : > { %v1818_v12 = vsub.f32 1.5, %v1817_v8 }
 0xacd   : > { %v1839_v2 = vadd.f32 %v2219_v29, %v1832_v10 }
 0xace   : > { %v1819_v14 = vmul.f32 %v2295_v62, %v1818_v12 }
 0xacf   : > { %2113 = vmatmul.msk.f32.gmra.mxu3 %vm742_vm1, %v1839_v2  ;;  %2116 = vmatmul.msk.f32.gmra.mxu1 %vm742_vm1, %v1839_v2 }
 0xad0   : > { %v1823_v15 = vsel %vm1822_vm4, %v2295_v62, %v1819_v14 }
 0xad1   : > { %v1826_v16 = vmul.f32 %v1823_v15, %v2999_v28 }
 0xad3   : > { %v1833_v18 = vmul.f32 %v2218_v55, %v1826_v16 }
 0xad5   : > { %v1840_v22 = vadd.f32 %v2219_v29, %v1833_v18 }
 0xad7   : > { %2114 = vmatmul.msk.f32.gmra.mxu3 %vm742_vm1, %v1840_v22  ;;  %2117 = vmatmul.msk.f32.gmra.mxu1 %vm742_vm1, %v1840_v22  ;;  %vm1882_vm1 = vcmask 122880  }
 0xb44   : > { %v1909_v9 = vpop.f32.mrf.mxu1 }
 0xb45   : > { %v1910_v3 = vadd.f32 %v2220_v13, %v1909_v9 }
 0xb47   : > { %1919 = vst.msk [vmem:[%s3056_s1 - $0x1] sm:$0xfe] %vm1918_vm5, %v1910_v3 }
 0xb4a   : > { %v1875_v24 = vpop.f32.mrf.mxu3 }
 0xb4b   : > { %v1876_v26 = vadd.f32 %v2221_v23, %v1875_v24 }
 0xb4c   : > { %v1912_v19 = vpop.f32.mrf.mxu1 }
 0xb4d   : > { %v1913_v17 = vadd.f32 %v2220_v13, %v1912_v19  ;;  %1883 = vst.msk [vmem:[%s679_s29] sm:$0x1] %vm1882_vm1, %v1876_v26 }
 0xb4e   : > { %2323 = shalt.err (!%p2320_p3)
}
 0xb4f   : > { %2132 = dma.vmem_to_hbm [thread:$0]  (%p2559_p5), %s1940_s2, 16, %s1942_s0, %s1924_s25   ;;  %1920 = vst.msk [vmem:[%s3056_s1 + $0x7] sm:$0xff] %vm706_vm0, %v1913_v17  ;;  %vm1921_vm6 = vcmask 516096  }
 0xb50   : > { %s3181_s24 = sld [smem:[#allocation26_spill]]  ;;  %s1953_s8 = sshll.u32 %s3056_s1, 4  ;;  %s1954_s8 = int_to_ptr.vmem [resolvable:$true] %s1953_s8 }
 0xb51   : > { %s1928_s9 = scalar_lea.sflag [#allocation5], %s3046_s26 }
 0xb52   : > { %v1878_v6 = vpop.f32.mrf.mxu3 }
 0xb54   : > { %v1915_v25 = vpop.f32.mrf.mxu1 }
 0xb55   : > { %v1916_v11 = vadd.f32 %v2220_v13, %v1915_v25 }
 0xb56   : > { %s1952_s5 = scalar_lea.hbm %s3181_s24, %s2123_s30  ;;  %s2344_s30 = scalar_lea.hbm %s3181_s24, 32 }
 0xb57   : > { %s1955_s7 = sshll.u32 %s1952_s5, 4  ;;  %1922 = vst.msk [vmem:[%s3056_s1 + $0xf] sm:$0x1] %vm1921_vm6, %v1916_v11  ;;  %s1956_s7 = int_to_ptr.hbm [resolvable:$true] %s1955_s7 }
 0xb58   : > { %s2338_s6 = sshra.s32 %s1956_s7, 4  ;;  %s2339_s6 = int_to_ptr.hbm [resolvable:$true] %s2338_s6 }
 0xb59   : > { %s2340_s0 = scalar_lea.hbm %s2339_s6, 16  ;;  %p2345_p9 = scmp.lt.s32.totalorder %s2339_s6, %s3181_s24 }
 0xb5a   : > { %p2341_p4 = scmp.ne.s32.totalorder %s2339_s6, %s2340_s0  ;;  %p2346_p10 = scmp.lt.s32.totalorder %s2344_s30, %s2340_s0 }
 0xb5c   : > { %p2342_p7 = pnand %p2341_p4, %p2559_p5  ;;  %p2347_p11 = por %p2346_p10, %p2345_p9 }
 0xb5e   : > { %p2343_p8 = pneg %p2342_p7 }
 0xb60   : > { %p2348_p12 = pnand %p2347_p11, %p2343_p8 }
 0xb62   : > { %2351 = shalt.err (!%p2348_p12)
}
 0xb63   : > { %s2404_s26 = smov 128   ;;  %s2405_s1 = smov 8   ;;  %v1880_v27 = vpop.f32.mrf.mxu3 }
 0xb64   : > { %2133 = dma.vmem_to_hbm [thread:$0]  (%p2559_p5), %s1954_s8, 256, %s1956_s7, %s1928_s9, %s2404_s26, %s2404_s26, %s2405_s1  }
 0xb65 PF: > { %s3182_s29 = sld [smem:[#allocation10_spill]] }
 0xb66   : > { %s3183_s5 = sld [smem:[#allocation8_spill]] }
 0xb6b   : > { %p2143_p13 = scmp.ge.s32.totalorder %s3182_s29, 2 }
 0xb6c   : > { %s1970_s2 = sand.u32 1, %s3183_s5  }
 0xb6d   : > { %p2137_p0 = pnand %p2143_p13, %p2563_p6  ;;  %s1971_s6 = scalar_lea.sflag [#allocation3], %s1970_s2 }
 0xb6f   : > { %p2138_p1 = pneg %p2137_p0 }
 0xb71   : > { %2369 = dma.done.wait (%p2138_p1), %s1971_s6, 16  }
 0xb72   : > { %2371 = vsyncadd (%p2138_p1), %s1971_s6, 4294967280  ;;  %s1980_s0 = scalar_lea.sflag [#allocation5], %s1970_s2 }
 0xb73   : > { %2373 = dma.done.wait (%p2138_p1), %s1980_s0, 256  }
 0xb74   : > { %2375 = vsyncadd (%p2138_p1), %s1980_s0, 4294967040  ;;  %s3185_s30 = sld [smem:[#allocation11_spill]]  ;;  %s3188_s3 = smov %s2382_s28 }
 0xb75   : > { %s3186_s25 = sld [smem:[#allocation9_spill]] }
 0xb76   : > { %s3187_s29 = sld [smem:[#allocation12_spill]] }
 0xb7a   : > { %p36_p5 = scmp.ge.s32.totalorder %s3185_s30, 4  }
 0xb7b   : > { %s3189_s28 = smov %s3186_s25 }
 0xb7c   :  { %38 = sbr.rel (!%p36_p5) target bundleno = 18 (0x12), region = 156 }
 0xb81   :  { %1986 = vsyncpa [#allocation3], 1 }
 0xb82   :  { %1988 = vsyncpa [#allocation3 + $0x1], 1 }
 0xb83   :  { %1989 = vsyncpa [#allocation5], 1 }
 0xb84   :  { %1991 = vsyncpa [#allocation5 + $0x1], 1 }

</bundles_post_ra>
